<compile_context>
chip_gen: v5e
topology: v5e:2x2
jax: 0.10.0
libtpu: 0.0.40
codegen_flags: <defaults>
</compile_context>

<pallas_src>
import jax
import jax.numpy as jnp
import numpy as np
from jax.experimental import pallas as pl
from jax.experimental.pallas import tpu as pltpu

CLIP_VALUE = -1.0e9          # self.clip_value
HALF_CLIP = -CLIP_VALUE / 2.0
TYPE_DIM = 3                 # GoalEmbed.type_dim


# --------------------------------------------------------------------------
# Pallas kernel: masked global reduction + GoalEmbed linear + fc_action MLP +
# fused fc_o1/fc_o2 node MLPs + clamping / visibility masking, all fused.
# --------------------------------------------------------------------------
def _single_policy_kernel(mask_ref, vis_ref, nrepr_ref, ngoal_ref, gbias_ref,
                          wg_n_ref, w_gg_ref, b_gg_ref, wa2_ref, ba2_ref,
                          wn_ref, w2_ref, b12_ref, b22_ref,
                          out_ref):
    f32, bf16 = jnp.float32, jnp.bfloat16
    node_repr = nrepr_ref[...]                                      # (TB, N, D) f32
    TB, N, D = node_repr.shape
    A = ba2_ref.shape[1]

    # --- global_repr: ((class_names == class_id).float() * node_repr).sum(-2)
    #     Mask is precomputed in the wrapper; kept fully in f32 (returned tensor).
    mask = mask_ref[...]                                            # (TB, N) f32
    global_repr = jnp.sum(mask[:, :, None] * node_repr, axis=1)     # (TB, D)

    # --- GoalEmbed: node_goal @ Wg[type_dim:] + (goal_type @ Wg[:type_dim] + bg)
    #     (goal-type branch precomposed at trace time into gbias).
    goal_repr = jnp.dot(ngoal_ref[...].astype(bf16), wg_n_ref[...],
                        preferred_element_type=f32) + gbias_ref[...]   # (TB, D)

    # --- ONE fused (TB, 2D) @ (2D, 3D) MXU pass over [goal | global]:
    #       lanes [0:D)  -> fc_action hidden (pre-ReLU)
    #       lanes [D:3D) -> goal/global contribution to fc_o1|fc_o2 hidden
    gg = jnp.concatenate([goal_repr, global_repr], axis=-1).astype(bf16)  # (TB, 2D)
    fused = jnp.dot(gg, w_gg_ref[...], preferred_element_type=f32) + b_gg_ref[...]

    h_act = jnp.maximum(fused[:, :D], 0.0)
    action = jnp.dot(h_act.astype(bf16), wa2_ref[...],
                     preferred_element_type=f32) + ba2_ref[...]
    action = jnp.clip(action, -HALF_CLIP, HALF_CLIP)                # (TB, A)

    pre_nodes = fused[:, D:]                                        # (TB, 2D)

    # --- fc_o1 / fc_o2 first layers fused along output lanes: one flat
    #     (TB*N, D) @ (D, 2D) MXU matmul for the node contribution.
    nflat = node_repr.reshape(TB * N, D).astype(bf16)
    h_nodes = jnp.dot(nflat, wn_ref[...], preferred_element_type=f32)   # (TB*N, 2D)
    h_nodes = h_nodes.reshape(TB, N, 2 * D) + pre_nodes[:, None, :]
    h_nodes = jnp.maximum(h_nodes, 0.0)

    # --- Second layers: ONE dense multiply by the stacked [Wo12 | Wo22] row,
    #     then two D-wide lane reductions (no multiply-by-zero halves).
    prod = h_nodes * w2_ref[...][None, :, :]                        # (TB, N, 2D)
    n1 = jnp.sum(prod[:, :, :D], axis=-1) + b12_ref[...]            # (TB, N)
    n2 = jnp.sum(prod[:, :, D:], axis=-1) + b22_ref[...]            # (TB, N)

    vis = vis_ref[...]                                              # (TB, N) f32
    n1 = jnp.clip(n1, -HALF_CLIP, HALF_CLIP) * vis + (1.0 - vis) * CLIP_VALUE
    n2 = jnp.clip(n2, -HALF_CLIP, HALF_CLIP) * vis + (1.0 - vis) * CLIP_VALUE

    # --- single lane-dense packed row: [global_repr | n1 | n2 | action | pad]
    #     written with one unmasked full-width store.
    used = D + 2 * N + A
    pad_w = out_ref.shape[1] - used
    pieces = [global_repr, n1, n2, action]
    if pad_w > 0:
        pieces.append(jnp.zeros((TB, pad_w), f32))
    out_ref[...] = jnp.concatenate(pieces, axis=-1)


# --------------------------------------------------------------------------
# Parameters (deterministic synthetic init; shapes from the module __init__).
# --------------------------------------------------------------------------
def init_params(key, *, repr_dim, num_actions, num_goals):
    D, A = repr_dim, num_actions
    ks = jax.random.split(key, 16)
    s = 0.1
    return {
        'goal_embed_table': jax.random.normal(ks[0], (num_goals, TYPE_DIM), jnp.float32),
        'Wg':   s * jax.random.normal(ks[1], (TYPE_DIM + D, D), jnp.float32),
        'bg':   s * jax.random.normal(ks[2], (D,), jnp.float32),
        'Wa1':  s * jax.random.normal(ks[3], (2 * D, D), jnp.float32),
        'ba1':  s * jax.random.normal(ks[4], (D,), jnp.float32),
        'Wa2':  s * jax.random.normal(ks[5], (D, A), jnp.float32),
        'ba2':  s * jax.random.normal(ks[6], (A,), jnp.float32),
        'Wo11': s * jax.random.normal(ks[7], (3 * D, D), jnp.float32),
        'bo11': s * jax.random.normal(ks[8], (D,), jnp.float32),
        'Wo12': s * jax.random.normal(ks[9], (D, 1), jnp.float32),
        'bo12': s * jax.random.normal(ks[10], (1,), jnp.float32),
        'Wo21': s * jax.random.normal(ks[11], (3 * D, D), jnp.float32),
        'bo21': s * jax.random.normal(ks[12], (D,), jnp.float32),
        'Wo22': s * jax.random.normal(ks[13], (D, 1), jnp.float32),
        'bo22': s * jax.random.normal(ks[14], (1,), jnp.float32),
    }


def _round_up(x, m):
    return ((x + m - 1) // m) * m


def _choose_tiling(BT, N, D, out_w):
    # Rows per grid step: multiple of 8, at least 2 grid steps whenever there
    # is more than one 8-row group (so v7x's two TensorCores both get work on
    # the "parallel" axis), >=4 steps for large BT, and small enough that the
    # double-buffered per-step working set stays well under the 32 MiB scoped
    # VMEM limit on every generation (v7x: 64 MiB physical; v5e/v6e: 128 MiB).
    tb = max(8, _round_up(pl.cdiv(BT, 2), 8))            # >= 2 grid steps
    if BT >= 512:
        tb = min(tb, max(128, _round_up(pl.cdiv(BT, 4), 8)))   # prefer >= 4 steps
    tb = min(tb, 512)
    # VMEM cap: double-buffered (nrepr + out) tiles plus ~2 f32 (TB,N,2D)
    # node-hidden intermediates; keep under ~20 MiB of the 32 MiB limit.
    per_row_bytes = 4 * (2 * (N * D + out_w) + 4 * N * D)
    tb_cap = max(8, (20 * 1024 * 1024 // per_row_bytes) // 8 * 8)
    tb = min(tb, tb_cap)
    bt_pad = _round_up(max(BT, tb), tb)
    return tb, bt_pad


# --------------------------------------------------------------------------
# Wrapper: glue (embedding gather, goal-node gather, flattening, weight
# splitting / fusing, row padding) in plain JAX; hot path in the Pallas kernel.
# --------------------------------------------------------------------------
def single_policy_forward(params, observations, goals, class_id_char, node_repr,
                          *, tile_rows=None):
    (class_names, class_ids, states, edges, edge_types,
     visibility, mask_nodes, mask_edges) = observations
    goal_id, goal_classnode_id, goal_node_id = goals

    f32, bf16 = jnp.float32, jnp.bfloat16
    bs, tstps, N, D = node_repr.shape
    A = params['Wa2'].shape[1]
    BT = bs * tstps

    USED = D + 2 * N + A
    OUT_W = max(128, _round_up(USED, 128))               # lane-dense output slab

    if tile_rows is not None:
        TB = tile_rows
        BT_pad = _round_up(max(BT, TB), TB)
    else:
        TB, BT_pad = _choose_tiling(BT, N, D, OUT_W)
    assert BT_pad % TB == 0 and TB % 8 == 0

    node_repr_f32 = node_repr.astype(f32)

    # GoalEmbed glue: embedding lookup then linear commutes with the linear, so
    # precompose the goal-type branch with its Wg slice (+ bg) at trace time.
    goal_type_proj = params['goal_embed_table'] @ params['Wg'][:TYPE_DIM]   # (G, D)
    gbias = goal_type_proj[goal_id] + params['bg']                           # (bs, D)
    gbias = jnp.broadcast_to(gbias[:, None, :], (bs, tstps, D)).reshape(BT, D).astype(f32)

    # node_repr[arange(bs), :, goal_node_id, :]  -> (bs, tstps, D)
    node_goal = node_repr_f32[jnp.arange(bs), :, goal_node_id, :].reshape(BT, D)

    # Precomputed (class_names == class_id) mask; drops one DMA stream and the
    # in-kernel integer compare.
    mask = (class_names == class_id_char[:, None, None]).astype(f32).reshape(BT, N)
    vis = visibility.reshape(BT, N).astype(f32)
    nrepr = node_repr_f32.reshape(BT, N, D)

    # Row padding so the tile always divides the (padded) row extent evenly.
    pad_rows = BT_pad - BT

    def pad0(x):
        if pad_rows == 0:
            return x
        return jnp.pad(x, ((0, pad_rows),) + ((0, 0),) * (x.ndim - 1))

    mask, vis, nrepr, node_goal, gbias = map(pad0, (mask, vis, nrepr, node_goal, gbias))

    # --- weight prep: torch concats become pre-fused bf16 weight slabs.
    Wg, Wa1, Wo11, Wo21 = params['Wg'], params['Wa1'], params['Wo11'], params['Wo21']
    wg_n = Wg[TYPE_DIM:].astype(bf16)                                        # (D, D)
    # One (2D, 3D) slab: rows = [goal | glob], cols = [fc_action h | fc_o1 h | fc_o2 h]
    w_gg = jnp.concatenate([
        jnp.concatenate([Wa1[:D], Wo11[2 * D:], Wo21[2 * D:]], axis=1),      # goal rows
        jnp.concatenate([Wa1[D:], Wo11[D:2 * D], Wo21[D:2 * D]], axis=1),    # glob rows
    ], axis=0).astype(bf16)                                                  # (2D, 3D)
    b_gg = jnp.concatenate([params['ba1'], params['bo11'], params['bo21']]).reshape(1, 3 * D)
    wa2 = params['Wa2'].astype(bf16)
    ba2 = params['ba2'].reshape(1, A)
    # fc_o1 / fc_o2 first layers fused along output lanes: [head1 | head2]
    wn = jnp.concatenate([Wo11[:D], Wo21[:D]], axis=1).astype(bf16)          # (D, 2D)
    # Second layers: dense stacked row [Wo12 | Wo22], reduced per D-wide half.
    w2 = jnp.concatenate([params['Wo12'][:, 0], params['Wo22'][:, 0]]).reshape(1, 2 * D)
    b12 = params['bo12'].reshape(1, 1)
    b22 = params['bo22'].reshape(1, 1)

    data_arrays = [mask, vis, nrepr, node_goal, gbias]
    weight_arrays = [wg_n, w_gg, b_gg, wa2, ba2, wn, w2, b12, b22]

    def row(*tail):
        nt = len(tail)
        return pl.BlockSpec((TB,) + tail, lambda i, _nt=nt: (i,) + (0,) * _nt)

    def const(arr):
        nd = arr.ndim
        return pl.BlockSpec(arr.shape, lambda i, _nd=nd: (0,) * _nd)

    data_specs = [row(N), row(N), row(N, D), row(D), row(D)]
    weight_specs = [const(w) for w in weight_arrays]

    out = pl.pallas_call(
        _single_policy_kernel,
        out_shape=jax.ShapeDtypeStruct((BT_pad, OUT_W), f32),
        grid_spec=pltpu.PrefetchScalarGridSpec(
            num_scalar_prefetch=0,
            grid=(BT_pad // TB,),
            in_specs=data_specs + weight_specs,
            out_specs=row(OUT_W),
        ),
        compiler_params=pltpu.CompilerParams(
            dimension_semantics=("parallel",),
            vmem_limit_bytes=32 * 1024 * 1024),
    )(*data_arrays, *weight_arrays)

    # Unpack the lane-dense slab: [global_repr | n1 | n2 | action | pad]
    out = out[:BT]
    global_repr = out[:, :D].reshape(bs, tstps, D)
    node_1_logits = out[:, D:D + N].reshape(bs, tstps, N)
    node_2_logits = out[:, D + N:D + 2 * N].reshape(bs, tstps, N)
    action_logits = out[:, D + 2 * N:USED].reshape(bs, tstps, A)
    return action_logits, node_1_logits, node_2_logits, (node_repr_f32, global_repr)


# --------------------------------------------------------------------------
# Pure-JAX reference mirroring the torch forward (for verification).
# --------------------------------------------------------------------------
def reference_forward(params, observations, goals, class_id_char, node_repr):
    class_names = observations[0]
    visibility = observations[5].astype(jnp.float32)
    goal_id, _, goal_node_id = goals
    bs, tstps, N, D = node_repr.shape
    node_repr = node_repr.astype(jnp.float32)

    eq = (class_names == class_id_char[:, None, None]).astype(jnp.float32)[..., None]
    global_repr = (eq * node_repr).sum(-2)                                   # (bs,t,D)

    goal_type = params['goal_embed_table'][goal_id]                          # (bs,3)
    goal_type = jnp.broadcast_to(goal_type[:, None, :], (bs, tstps, TYPE_DIM))
    node_goal = node_repr[jnp.arange(bs), :, goal_node_id, :]
    goal_repr = jnp.concatenate([goal_type, node_goal], 2) @ params['Wg'] + params['bg']

    concat_nodes = jnp.concatenate([
        node_repr,
        jnp.broadcast_to(global_repr[:, :, None, :], (bs, tstps, N, D)),
        jnp.broadcast_to(goal_repr[:, :, None, :], (bs, tstps, N, D))], -1)
    global_and_goal = jnp.concatenate([goal_repr, global_repr], 2)

    def mlp2(x, w1, b1, w2, b2):
        return jnp.maximum(x @ w1 + b1, 0.0) @ w2 + b2

    action = mlp2(global_and_goal, params['Wa1'], params['ba1'], params['Wa2'], params['ba2'])
    n1 = mlp2(concat_nodes, params['Wo11'], params['bo11'], params['Wo12'], params['bo12'])[..., 0]
    n2 = mlp2(concat_nodes, params['Wo21'], params['bo21'], params['Wo22'], params['bo22'])[..., 0]

    lo, hi = CLIP_VALUE / 2.0, -CLIP_VALUE / 2.0
    action = jnp.clip(action, lo, hi)
    n1 = jnp.clip(n1, lo, hi) * visibility + (1 - visibility) * CLIP_VALUE
    n2 = jnp.clip(n2, lo, hi) * visibility + (1 - visibility) * CLIP_VALUE
    return action, n1, n2, (node_repr, global_repr)


if __name__ == "__main__":
    bs, tstps, num_nodes = 2, 8, 16
    repr_dim = 32            # dataset.args.state_dim == dataset.args.object_dim
    num_actions = 8          # len(dataset.action_dict)
    num_goals = 10           # len(dataset.object_dict)
    num_classes = 5

    key = jax.random.PRNGKey(0)
    kp, kd = jax.random.split(key)
    params = init_params(kp, repr_dim=repr_dim, num_actions=num_actions, num_goals=num_goals)

    kk = jax.random.split(kd, 10)
    class_names = jax.random.randint(kk[0], (bs, tstps, num_nodes), 0, num_classes, jnp.int32)
    class_ids = jax.random.randint(kk[1], (bs, tstps, num_nodes), 0, 100, jnp.int32)
    states = jax.random.normal(kk[2], (bs, tstps, num_nodes, 4), jnp.float32)
    edges = jnp.zeros((bs, tstps, num_nodes, num_nodes), jnp.int32)
    edge_types = jnp.zeros((bs, tstps, num_nodes, num_nodes), jnp.int32)
    visibility = jax.random.bernoulli(kk[3], 0.7, (bs, tstps, num_nodes)).astype(jnp.float32)
    mask_nodes = jnp.ones((bs, tstps, num_nodes), jnp.float32)
    mask_edges = jnp.ones((bs, tstps, num_nodes, num_nodes), jnp.float32)
    observations = (class_names, class_ids, states, edges, edge_types,
                    visibility, mask_nodes, mask_edges)

    # TODO(synk): networks.GraphStateRepresentation is an external module not
    # provided here; its node_repr output (the only piece used downstream) is
    # supplied directly as a deterministic input.
    node_repr = jax.random.normal(kk[4], (bs, tstps, num_nodes, repr_dim), jnp.float32)

    goal_id = jax.random.randint(kk[5], (bs,), 0, num_goals, jnp.int32)
    goal_classnode_id = jax.random.randint(kk[6], (bs,), 0, num_nodes, jnp.int32)
    goal_node_id = jax.random.randint(kk[7], (bs,), 0, num_nodes, jnp.int32)
    goals = (goal_id, goal_classnode_id, goal_node_id)
    class_id_char = jax.random.randint(kk[8], (bs,), 0, num_classes, jnp.int32)

    outs = single_policy_forward(params, observations, goals, class_id_char, node_repr)
    outs = jax.block_until_ready(outs)
    act, n1, n2, (nr, gr) = outs

    ra, rn1, rn2, (_, rgr) = reference_forward(params, observations, goals,
                                               class_id_char, node_repr)
    # bf16 MXU operands vs. a pure-f32 reference -> 2e-2 tol; global_repr is
    # kept entirely in f32 -> 1e-5.
    np.testing.assert_allclose(np.asarray(act), np.asarray(ra), rtol=2e-2, atol=2e-2)
    np.testing.assert_allclose(np.asarray(n1), np.asarray(rn1), rtol=2e-2, atol=2e-2)
    np.testing.assert_allclose(np.asarray(n2), np.asarray(rn2), rtol=2e-2, atol=2e-2)
    np.testing.assert_allclose(np.asarray(gr), np.asarray(rgr), rtol=1e-5, atol=1e-5)
    print("KERNEL_OK")
</pallas_src>

<mosaic_0001>
module attributes {stable_mosaic.version = 11 : i64} {
  func.func @_single_policy_kernel(%arg0: i32, %arg1: memref<8x16xf32, #tpu.memory_space<vmem>>, %arg2: memref<8x16xf32, #tpu.memory_space<vmem>>, %arg3: memref<8x16x32xf32, #tpu.memory_space<vmem>>, %arg4: memref<8x32xf32, #tpu.memory_space<vmem>>, %arg5: memref<8x32xf32, #tpu.memory_space<vmem>>, %arg6: memref<32x32xbf16, #tpu.memory_space<vmem>>, %arg7: memref<64x96xbf16, #tpu.memory_space<vmem>>, %arg8: memref<1x96xf32, #tpu.memory_space<vmem>>, %arg9: memref<32x8xbf16, #tpu.memory_space<vmem>>, %arg10: memref<1x8xf32, #tpu.memory_space<vmem>>, %arg11: memref<32x64xbf16, #tpu.memory_space<vmem>>, %arg12: memref<1x64xf32, #tpu.memory_space<vmem>>, %arg13: memref<1x1xf32, #tpu.memory_space<vmem>>, %arg14: memref<1x1xf32, #tpu.memory_space<vmem>>, %arg15: memref<8x128xf32, #tpu.memory_space<vmem>>) attributes {dimension_semantics = [#tpu.dimension_semantics<parallel>], iteration_bounds = array<i64: 2>, scalar_prefetch = 0 : i64, scratch_operands = 0 : i64, tpu.core_type = #tpu.core_type<tc>, window_params = [{transform_indices = @transform_0, window_bounds = array<i64: 8, 16>}, {transform_indices = @transform_1, window_bounds = array<i64: 8, 16>}, {transform_indices = @transform_2, window_bounds = array<i64: 8, 16, 32>}, {transform_indices = @transform_3, window_bounds = array<i64: 8, 32>}, {transform_indices = @transform_4, window_bounds = array<i64: 8, 32>}, {pipeline_mode = #tpu.pipeline_mode<synchronous>, transform_indices = @transform_5, window_bounds = array<i64: 32, 32>}, {pipeline_mode = #tpu.pipeline_mode<synchronous>, transform_indices = @transform_6, window_bounds = array<i64: 64, 96>}, {pipeline_mode = #tpu.pipeline_mode<synchronous>, transform_indices = @transform_7, window_bounds = array<i64: 1, 96>}, {pipeline_mode = #tpu.pipeline_mode<synchronous>, transform_indices = @transform_8, window_bounds = array<i64: 32, 8>}, {pipeline_mode = #tpu.pipeline_mode<synchronous>, transform_indices = @transform_9, window_bounds = array<i64: 1, 8>}, {pipeline_mode = #tpu.pipeline_mode<synchronous>, transform_indices = @transform_10, window_bounds = array<i64: 32, 64>}, {pipeline_mode = #tpu.pipeline_mode<synchronous>, transform_indices = @transform_11, window_bounds = array<i64: 1, 64>}, {pipeline_mode = #tpu.pipeline_mode<synchronous>, transform_indices = @transform_12, window_bounds = array<i64: 1, 1>}, {pipeline_mode = #tpu.pipeline_mode<synchronous>, transform_indices = @transform_13, window_bounds = array<i64: 1, 1>}, {transform_indices = @transform_14, window_bounds = array<i64: 8, 128>}]} {
    %c0 = arith.constant 0 : index
    %c0_0 = arith.constant 0 : index
    %c0_1 = arith.constant 0 : index
    %0 = vector.load %arg3[%c0, %c0_0, %c0_1] : memref<8x16x32xf32, #tpu.memory_space<vmem>>, vector<8x16x32xf32>
    %c0_2 = arith.constant 0 : index
    %c0_3 = arith.constant 0 : index
    %1 = vector.load %arg1[%c0_2, %c0_3] : memref<8x16xf32, #tpu.memory_space<vmem>>, vector<8x16xf32>
    %2 = vector.shape_cast %1 : vector<8x16xf32> to vector<8x16x1xf32>
    %3 = vector.broadcast %2 : vector<8x16x1xf32> to vector<8x16x32xf32>
    %4 = arith.mulf %3, %0 : vector<8x16x32xf32>
    %cst = arith.constant dense<0.000000e+00> : vector<8x32xf32>
    %5 = vector.multi_reduction <add>, %4, %cst [1] : vector<8x16x32xf32> to vector<8x32xf32>
    %c0_4 = arith.constant 0 : index
    %c0_5 = arith.constant 0 : index
    %6 = vector.load %arg4[%c0_4, %c0_5] : memref<8x32xf32, #tpu.memory_space<vmem>>, vector<8x32xf32>
    %7 = arith.truncf %6 : vector<8x32xf32> to vector<8x32xbf16>
    %c0_6 = arith.constant 0 : index
    %c0_7 = arith.constant 0 : index
    %8 = vector.load %arg6[%c0_6, %c0_7] : memref<32x32xbf16, #tpu.memory_space<vmem>>, vector<32x32xbf16>
    %cst_8 = arith.constant dense<0.000000e+00> : vector<8x32xf32>
    %9 = tpu.matmul %7, %8, %cst_8 {dimension_numbers = #tpu.dot_dimension_numbers<[1], [0], [0], [1], [0, 0, 1, 1], [], []>} : vector<8x32xbf16>, vector<32x32xbf16>, vector<8x32xf32> -> vector<8x32xf32>
    %c0_9 = arith.constant 0 : index
    %c0_10 = arith.constant 0 : index
    %10 = vector.load %arg5[%c0_9, %c0_10] : memref<8x32xf32, #tpu.memory_space<vmem>>, vector<8x32xf32>
    %11 = arith.addf %9, %10 : vector<8x32xf32>
    %12 = tpu.concatenate %11, %5 in 1 : vector<8x32xf32>, vector<8x32xf32> -> vector<8x64xf32>
    %13 = arith.truncf %12 : vector<8x64xf32> to vector<8x64xbf16>
    %c0_11 = arith.constant 0 : index
    %c0_12 = arith.constant 0 : index
    %14 = vector.load %arg7[%c0_11, %c0_12] : memref<64x96xbf16, #tpu.memory_space<vmem>>, vector<64x96xbf16>
    %cst_13 = arith.constant dense<0.000000e+00> : vector<8x96xf32>
    %15 = tpu.matmul %13, %14, %cst_13 {dimension_numbers = #tpu.dot_dimension_numbers<[1], [0], [0], [1], [0, 0, 1, 1], [], []>} : vector<8x64xbf16>, vector<64x96xbf16>, vector<8x96xf32> -> vector<8x96xf32>
    %c0_14 = arith.constant 0 : index
    %c0_15 = arith.constant 0 : index
    %16 = vector.load %arg8[%c0_14, %c0_15] : memref<1x96xf32, #tpu.memory_space<vmem>>, vector<1x96xf32>
    %17 = vector.broadcast %16 : vector<1x96xf32> to vector<8x96xf32>
    %18 = arith.addf %15, %17 : vector<8x96xf32>
    %19 = vector.extract_strided_slice %18 {offsets = [0, 0], sizes = [8, 32], strides = [1, 1]} : vector<8x96xf32> to vector<8x32xf32>
    %cst_16 = arith.constant 0.000000e+00 : f32
    %20 = vector.broadcast %cst_16 : f32 to vector<8x32xf32>
    %21 = arith.maximumf %19, %20 : vector<8x32xf32>
    %22 = arith.truncf %21 : vector<8x32xf32> to vector<8x32xbf16>
    %c0_17 = arith.constant 0 : index
    %c0_18 = arith.constant 0 : index
    %23 = vector.load %arg9[%c0_17, %c0_18] : memref<32x8xbf16, #tpu.memory_space<vmem>>, vector<32x8xbf16>
    %cst_19 = arith.constant dense<0.000000e+00> : vector<8x8xf32>
    %24 = tpu.matmul %22, %23, %cst_19 {dimension_numbers = #tpu.dot_dimension_numbers<[1], [0], [0], [1], [0, 0, 1, 1], [], []>} : vector<8x32xbf16>, vector<32x8xbf16>, vector<8x8xf32> -> vector<8x8xf32>
    %c0_20 = arith.constant 0 : index
    %c0_21 = arith.constant 0 : index
    %25 = vector.load %arg10[%c0_20, %c0_21] : memref<1x8xf32, #tpu.memory_space<vmem>>, vector<1x8xf32>
    %26 = vector.broadcast %25 : vector<1x8xf32> to vector<8x8xf32>
    %27 = arith.addf %24, %26 : vector<8x8xf32>
    %cst_22 = arith.constant -5.000000e+08 : f32
    %cst_23 = arith.constant 5.000000e+08 : f32
    %28 = vector.broadcast %cst_22 : f32 to vector<8x8xf32>
    %29 = arith.maximumf %28, %27 : vector<8x8xf32>
    %30 = vector.broadcast %cst_23 : f32 to vector<8x8xf32>
    %31 = arith.minimumf %30, %29 : vector<8x8xf32>
    %32 = vector.extract_strided_slice %18 {offsets = [0, 32], sizes = [8, 64], strides = [1, 1]} : vector<8x96xf32> to vector<8x64xf32>
    %33 = vector.shape_cast %0 : vector<8x16x32xf32> to vector<128x32xf32>
    %34 = arith.truncf %33 : vector<128x32xf32> to vector<128x32xbf16>
    %c0_24 = arith.constant 0 : index
    %c0_25 = arith.constant 0 : index
    %35 = vector.load %arg11[%c0_24, %c0_25] : memref<32x64xbf16, #tpu.memory_space<vmem>>, vector<32x64xbf16>
    %cst_26 = arith.constant dense<0.000000e+00> : vector<128x64xf32>
    %36 = tpu.matmul %34, %35, %cst_26 {dimension_numbers = #tpu.dot_dimension_numbers<[1], [0], [0], [1], [0, 0, 1, 1], [], []>} : vector<128x32xbf16>, vector<32x64xbf16>, vector<128x64xf32> -> vector<128x64xf32>
    %37 = vector.shape_cast %36 : vector<128x64xf32> to vector<8x16x64xf32>
    %38 = vector.shape_cast %32 : vector<8x64xf32> to vector<8x1x64xf32>
    %39 = vector.broadcast %38 : vector<8x1x64xf32> to vector<8x16x64xf32>
    %40 = arith.addf %37, %39 : vector<8x16x64xf32>
    %cst_27 = arith.constant 0.000000e+00 : f32
    %41 = vector.broadcast %cst_27 : f32 to vector<8x16x64xf32>
    %42 = arith.maximumf %40, %41 : vector<8x16x64xf32>
    %c0_28 = arith.constant 0 : index
    %c0_29 = arith.constant 0 : index
    %43 = vector.load %arg12[%c0_28, %c0_29] : memref<1x64xf32, #tpu.memory_space<vmem>>, vector<1x64xf32>
    %44 = vector.shape_cast %43 : vector<1x64xf32> to vector<1x1x64xf32>
    %45 = vector.broadcast %44 : vector<1x1x64xf32> to vector<8x16x64xf32>
    %46 = arith.mulf %42, %45 : vector<8x16x64xf32>
    %47 = vector.extract_strided_slice %46 {offsets = [0, 0, 0], sizes = [8, 16, 32], strides = [1, 1, 1]} : vector<8x16x64xf32> to vector<8x16x32xf32>
    %cst_30 = arith.constant dense<0.000000e+00> : vector<8x16xf32>
    %48 = vector.multi_reduction <add>, %47, %cst_30 [2] : vector<8x16x32xf32> to vector<8x16xf32>
    %c0_31 = arith.constant 0 : index
    %c0_32 = arith.constant 0 : index
    %49 = vector.load %arg13[%c0_31, %c0_32] : memref<1x1xf32, #tpu.memory_space<vmem>>, vector<1x1xf32>
    %50 = vector.broadcast %49 : vector<1x1xf32> to vector<8x16xf32>
    %51 = arith.addf %48, %50 : vector<8x16xf32>
    %52 = vector.extract_strided_slice %46 {offsets = [0, 0, 32], sizes = [8, 16, 32], strides = [1, 1, 1]} : vector<8x16x64xf32> to vector<8x16x32xf32>
    %cst_33 = arith.constant dense<0.000000e+00> : vector<8x16xf32>
    %53 = vector.multi_reduction <add>, %52, %cst_33 [2] : vector<8x16x32xf32> to vector<8x16xf32>
    %c0_34 = arith.constant 0 : index
    %c0_35 = arith.constant 0 : index
    %54 = vector.load %arg14[%c0_34, %c0_35] : memref<1x1xf32, #tpu.memory_space<vmem>>, vector<1x1xf32>
    %55 = vector.broadcast %54 : vector<1x1xf32> to vector<8x16xf32>
    %56 = arith.addf %53, %55 : vector<8x16xf32>
    %c0_36 = arith.constant 0 : index
    %c0_37 = arith.constant 0 : index
    %57 = vector.load %arg2[%c0_36, %c0_37] : memref<8x16xf32, #tpu.memory_space<vmem>>, vector<8x16xf32>
    %cst_38 = arith.constant -5.000000e+08 : f32
    %cst_39 = arith.constant 5.000000e+08 : f32
    %58 = vector.broadcast %cst_38 : f32 to vector<8x16xf32>
    %59 = arith.maximumf %58, %51 : vector<8x16xf32>
    %60 = vector.broadcast %cst_39 : f32 to vector<8x16xf32>
    %61 = arith.minimumf %60, %59 : vector<8x16xf32>
    %62 = arith.mulf %61, %57 : vector<8x16xf32>
    %cst_40 = arith.constant 1.000000e+00 : f32
    %63 = vector.broadcast %cst_40 : f32 to vector<8x16xf32>
    %64 = arith.subf %63, %57 : vector<8x16xf32>
    %cst_41 = arith.constant -1.000000e+09 : f32
    %65 = vector.broadcast %cst_41 : f32 to vector<8x16xf32>
    %66 = arith.mulf %64, %65 : vector<8x16xf32>
    %67 = arith.addf %62, %66 : vector<8x16xf32>
    %cst_42 = arith.constant -5.000000e+08 : f32
    %cst_43 = arith.constant 5.000000e+08 : f32
    %68 = vector.broadcast %cst_42 : f32 to vector<8x16xf32>
    %69 = arith.maximumf %68, %56 : vector<8x16xf32>
    %70 = vector.broadcast %cst_43 : f32 to vector<8x16xf32>
    %71 = arith.minimumf %70, %69 : vector<8x16xf32>
    %72 = arith.mulf %71, %57 : vector<8x16xf32>
    %cst_44 = arith.constant 1.000000e+00 : f32
    %73 = vector.broadcast %cst_44 : f32 to vector<8x16xf32>
    %74 = arith.subf %73, %57 : vector<8x16xf32>
    %cst_45 = arith.constant -1.000000e+09 : f32
    %75 = vector.broadcast %cst_45 : f32 to vector<8x16xf32>
    %76 = arith.mulf %74, %75 : vector<8x16xf32>
    %77 = arith.addf %72, %76 : vector<8x16xf32>
    %cst_46 = arith.constant 0.000000e+00 : f32
    %78 = vector.broadcast %cst_46 : f32 to vector<8x56xf32>
    %79 = tpu.concatenate %5, %67, %77, %31, %78 in 1 : vector<8x32xf32>, vector<8x16xf32>, vector<8x16xf32>, vector<8x8xf32>, vector<8x56xf32> -> vector<8x128xf32>
    %c0_47 = arith.constant 0 : index
    %c0_48 = arith.constant 0 : index
    %80 = vector.load %arg15[%c0_47, %c0_48] : memref<8x128xf32, #tpu.memory_space<vmem>>, vector<8x128xf32>
    tpu.vector_store %arg15[%c0_47, %c0_48], %79 {strides = array<i32>} : memref<8x128xf32, #tpu.memory_space<vmem>>, vector<8x128xf32>,
    return
  }
  func.func @transform_0(%arg0: i32) -> (i32, i32) {
    %c0_i32 = arith.constant 0 : i32
    %c0_i32_0 = arith.constant 0 : i32
    return %arg0, %c0_i32 : i32, i32
  }
  func.func @transform_1(%arg0: i32) -> (i32, i32) {
    %c0_i32 = arith.constant 0 : i32
    %c0_i32_0 = arith.constant 0 : i32
    return %arg0, %c0_i32 : i32, i32
  }
  func.func @transform_2(%arg0: i32) -> (i32, i32, i32) {
    %c0_i32 = arith.constant 0 : i32
    %c0_i32_0 = arith.constant 0 : i32
    %c0_i32_1 = arith.constant 0 : i32
    return %arg0, %c0_i32, %c0_i32_0 : i32, i32, i32
  }
  func.func @transform_3(%arg0: i32) -> (i32, i32) {
    %c0_i32 = arith.constant 0 : i32
    %c0_i32_0 = arith.constant 0 : i32
    return %arg0, %c0_i32 : i32, i32
  }
  func.func @transform_4(%arg0: i32) -> (i32, i32) {
    %c0_i32 = arith.constant 0 : i32
    %c0_i32_0 = arith.constant 0 : i32
    return %arg0, %c0_i32 : i32, i32
  }
  func.func @transform_5(%arg0: i32) -> (i32, i32) {
    %c0_i32 = arith.constant 0 : i32
    %c0_i32_0 = arith.constant 0 : i32
    %c0_i32_1 = arith.constant 0 : i32
    return %c0_i32, %c0_i32_0 : i32, i32
  }
  func.func @transform_6(%arg0: i32) -> (i32, i32) {
    %c0_i32 = arith.constant 0 : i32
    %c0_i32_0 = arith.constant 0 : i32
    %c0_i32_1 = arith.constant 0 : i32
    return %c0_i32, %c0_i32_0 : i32, i32
  }
  func.func @transform_7(%arg0: i32) -> (i32, i32) {
    %c0_i32 = arith.constant 0 : i32
    %c0_i32_0 = arith.constant 0 : i32
    %c0_i32_1 = arith.constant 0 : i32
    return %c0_i32, %c0_i32_0 : i32, i32
  }
  func.func @transform_8(%arg0: i32) -> (i32, i32) {
    %c0_i32 = arith.constant 0 : i32
    %c0_i32_0 = arith.constant 0 : i32
    %c0_i32_1 = arith.constant 0 : i32
    return %c0_i32, %c0_i32_0 : i32, i32
  }
  func.func @transform_9(%arg0: i32) -> (i32, i32) {
    %c0_i32 = arith.constant 0 : i32
    %c0_i32_0 = arith.constant 0 : i32
    %c0_i32_1 = arith.constant 0 : i32
    return %c0_i32, %c0_i32_0 : i32, i32
  }
  func.func @transform_10(%arg0: i32) -> (i32, i32) {
    %c0_i32 = arith.constant 0 : i32
    %c0_i32_0 = arith.constant 0 : i32
    %c0_i32_1 = arith.constant 0 : i32
    return %c0_i32, %c0_i32_0 : i32, i32
  }
  func.func @transform_11(%arg0: i32) -> (i32, i32) {
    %c0_i32 = arith.constant 0 : i32
    %c0_i32_0 = arith.constant 0 : i32
    %c0_i32_1 = arith.constant 0 : i32
    return %c0_i32, %c0_i32_0 : i32, i32
  }
  func.func @transform_12(%arg0: i32) -> (i32, i32) {
    %c0_i32 = arith.constant 0 : i32
    %c0_i32_0 = arith.constant 0 : i32
    %c0_i32_1 = arith.constant 0 : i32
    return %c0_i32, %c0_i32_0 : i32, i32
  }
  func.func @transform_13(%arg0: i32) -> (i32, i32) {
    %c0_i32 = arith.constant 0 : i32
    %c0_i32_0 = arith.constant 0 : i32
    %c0_i32_1 = arith.constant 0 : i32
    return %c0_i32, %c0_i32_0 : i32, i32
  }
  func.func @transform_14(%arg0: i32) -> (i32, i32) {
    %c0_i32 = arith.constant 0 : i32
    %c0_i32_0 = arith.constant 0 : i32
    return %arg0, %c0_i32 : i32, i32
  }
}

</mosaic_0001>

<bundles_post_ra>
// kernel: tpu_custom_call.1
= control target key start
LH: loop header
LB: loop body
LE: loop exit
PB: predicated region body
PF: predicated region fallthrough
CT: control target
= control target key end

     0   :  { %s3673_s0 = inlined_call_operand.vmem [shape: f32[16,16], index: 0, kind: input, shape index: {}]   ;;  %s3674_s1 = inlined_call_operand.hbm [shape: f32[16,16], index: 1, kind: input, shape index: {}]   ;;  %s3675_s2 = inlined_call_operand.hbm [shape: f32[16,16,32], index: 2, kind: input, shape index: {}]   ;;  %s3676_s3 = inlined_call_operand.hbm [shape: f32[16,32], index: 3, kind: input, shape index: {}]   ;;  %s3677_s4 = inlined_call_operand.hbm [shape: f32[16,32], index: 4, kind: input, shape index: {}]   ;;  %s3678_s5 = inlined_call_operand.hbm [shape: bf16[32,32], index: 5, kind: input, shape index: {}]   ;;  %s3679_s6 = inlined_call_operand.hbm [shape: bf16[64,96], index: 6, kind: input, shape index: {}]   ;;  %s3680_s7 = inlined_call_operand.vmem [shape: f32[1,96], index: 7, kind: input, shape index: {}]   ;;  %s3681_s8 = inlined_call_operand.vmem [shape: bf16[32,8], index: 8, kind: input, shape index: {}]   ;;  %s3682_s9 = inlined_call_operand.vmem [shape: f32[1,8], index: 9, kind: input, shape index: {}]   ;;  %s3683_s10 = inlined_call_operand.hbm [shape: bf16[32,64], index: 10, kind: input, shape index: {}]   ;;  %s3684_s11 = inlined_call_operand.vmem [shape: f32[1,64], index: 11, kind: input, shape index: {}]   ;;  %s3685_s12 = inlined_call_operand.<no memory space> [shape: f32[1,1], index: 12, kind: input, shape index: {}]   ;;  %s3686_s14 = inlined_call_operand.hbm [shape: f32[16,128], index: 14, kind: output, shape index: {}]   ;;  %s3687_s13 = inlined_call_operand.<no memory space> [shape: f32[1,1], index: 13, kind: input, shape index: {}]  }
   0x1   :  { %3702 = sst [smem:[#allocation31_spill]] %s3675_s2  ;;  %v19_v0 = vstv %s3685_s12  ;;  %v21_v1 = vstv %s3687_s13 }
   0x2   :  { %3703 = sst [smem:[#allocation32_spill]] %s3678_s5  ;;  %20 = vst [vmem:[#allocation2] sm:$0x1] %v19_v0 }
   0x3   :  { %3704 = sst [smem:[#allocation33_spill]] %s3679_s6  ;;  %22 = vst [vmem:[#allocation3] sm:$0x1] %v21_v1 }
   0x4   :  { %3705 = sst [smem:[#allocation34_spill]] %s3683_s10 }
   0x5   :  { %3706 = sst [smem:[#allocation35_spill]] %s3686_s14 }
   0x6   :  { %23 = vsyncpa [#allocation5], 0 }
   0x7   :  { %25 = vsyncpa [#allocation5 + $0x1], 0 }
   0x8   :  { %26 = vsyncpa [#allocation8], 0 }
   0x9   :  { %28 = vsyncpa [#allocation8 + $0x1], 0 }
   0xa   :  { %29 = vsyncpa [#allocation11], 0 }
   0xb   :  { %31 = vsyncpa [#allocation11 + $0x1], 0 }
   0xc   :  { %32 = vsyncpa [#allocation14], 0 }
   0xd   :  { %33 = vsyncpa [#allocation6], 0 }
   0xe   :  { %35 = vsyncpa [#allocation6 + $0x1], 0  ;;  %s2861_s17 = smov 0   ;;  %s2863_s18 = smov 0  }
   0xf   :  { %s2865_s12 = smov 0   ;;  %s2867_s19 = smov 0  }
  0x10 LB: > { %3707 = sst [smem:[#allocation23_spill]] %s2755_s17  ;;  %s2882_s13 = sadd.s32 4294967295, %s2767_s19   ;;  %s2767_s19 = sphi %s2867_s19, %s3740_s19   ;;  %s2763_s12 = sphi %s2865_s12, %s3742_s12   ;;  %s2759_s18 = sphi %s2863_s18, %s3744_s18   ;;  %s2755_s17 = sphi %s2861_s17, %s3743_s17  }
  0x11   : > { %3708 = sst [smem:[#allocation24_spill]] %s2763_s12  ;;  %s2212_s20 = sadd.s32 4294967294, %s2767_s19  }
  0x12   : > { %p87_p0 = scmp.ne.s32.totalorder %s2759_s18, %s2755_s17  ;;  %p3697_p1 = scmp.eq.s32.totalorder %s2882_s13, 0 }
  0x13   : > { %p378_p2 = scmp.eq.s32.totalorder %s2882_s13, 1  ;;  %p384_p3 = scmp.eq.s32.totalorder %s2212_s20, 1 }
  0x14   : > { %p2891_p4 = por %p3697_p1, %p87_p0  ;;  %p2213_p5 = scmp.ge.s32.totalorder %s2767_s19, 1 }
  0x15   : > { %p2896_p6 = por %p384_p3, %p87_p0  ;;  %p391_p7 = scmp.lt.s32.totalorder %s2767_s19, 3 }
  0x16   : > { %s3712_s5 = sld [smem:[#allocation32_spill]]  ;;  %s2769_s27 = smov [#allocation12]  }
  0x17   : > { %s3710_s22 = scalar_select %p2896_p6, 1, 0 }
  0x18   : > { %p2904_p8 = pnand %p2213_p5, %p391_p7  ;;  %s404_s28 = sshll.u32 %s2769_s27, 4  ;;  %s405_s28 = int_to_ptr.vmem [resolvable:$true] %s404_s28 }
  0x19   : > { %3711 = sst [smem:[#allocation25_spill]] %s3710_s22  ;;  %s3688_s20 = smov 64  }
  0x1a   : > { %p2364_p9 = pneg %p2904_p8  ;;  %s3715_s6 = sld [smem:[#allocation33_spill]] }
  0x1b   : > { %s3689_s23 = smov 4   ;;  %s2772_s24 = smov [#allocation13]  }
  0x1c   : > { %s402_s25 = sshll.u32 %s3712_s5, 4  ;;  %p2912_p10 = pnand %p2364_p9, %p3697_p1  ;;  %s403_s25 = int_to_ptr.hbm [resolvable:$true] %s402_s25 }
  0x1d   : > { %s418_s27 = sshll.u32 %s2772_s24, 4  ;;  %s2931_s30 = sadd.s32 1, %s2767_s19   ;;  %s419_s27 = int_to_ptr.vmem [resolvable:$true] %s418_s27 }
  0x1e   : > { %2367 = dma.hbm_to_vmem [thread:$0]  (!%p2912_p10), %s403_s25, 256, %s405_s28, [#allocation11], %s3688_s20, %s3688_s20, %s3689_s23  }
  0x1f   : > { %3716 = sst [smem:[#allocation26_spill]] %s2931_s30  ;;  %s74_s15 = sadd.s32 1, %s2763_s12 }
  0x20   : > { %s416_s16 = sshll.u32 %s3715_s6, 4  ;;  %s71_s5 = ssub.s32 %s2767_s19, %s2931_s30  ;;  %s417_s16 = int_to_ptr.hbm [resolvable:$true] %s416_s16 }
  0x21   : > { %2370 = dma.hbm_to_vmem [thread:$0]  (!%p2912_p10), %s417_s16, 512, %s419_s27, [#allocation14], %s3688_s20, %s3688_s20, %s3689_s23  }
  0x22   : > { %p81_p12 = scmp.ne.s32.totalorder %s2763_s12, %s2759_s18  ;;  %p72_p13 = scmp.eq.s32.totalorder %s71_s5, 0 }
  0x23   : > { %p82_p0 = scmp.eq.s32.totalorder %s2767_s19, 0  ;;  %p2394_p5 = scmp.lt.s32.totalorder %s2767_s19, 2 }
  0x24   : > { %p2941_p3 = por %p378_p2, %p81_p12  ;;  %s2950_s24 = sand.u32 1, %s2763_s12  }
  0x25   : > { %s2947_s28 = scalar_select %p72_p13, %s2763_s12, %s74_s15  }
  0x26   : > { %s3717_s25 = scalar_select %p2941_p3, 1, 0 }
  0x27   : > { %3719 = sst [smem:[#allocation28_spill]] %s2947_s28  ;;  %p83_p7 = por %p82_p0, %p81_p12 }
  0x28   : > { %3718 = sst [smem:[#allocation27_spill]] %s3717_s25  ;;  %s3698_s16 = sand.u32 1, %s2767_s19  }
  0x29   : > { %s2220_s27 = sshll.u32 %s2950_s24, 7  ;;  %p2954_p9 = pnand %p2394_p5, %p83_p7 }
  0x2a   : > { %s2327_s5 = sshll.u32 %s2767_s19, 7  ;;  %s3721_s2 = sld [smem:[#allocation31_spill]] }
  0x2b   : > { %s494_s15 = scalar_lea.vmem [#allocation7], %s2220_s27  ;;  %s2964_s12 = scalar_lea.sflag [#allocation8], %s3698_s16 }
  0x2c   : > { %s503_s28 = sshll.u32 %s494_s15, 4  ;;  %p2539_p12 = pneg %p2954_p9  ;;  %s504_s28 = int_to_ptr.vmem [resolvable:$true] %s503_s28 }
  0x30   : > { %s500_s30 = scalar_lea.hbm %s3721_s2, %s2327_s5 }
  0x31   : > { %s501_s22 = sshll.u32 %s500_s30, 4  ;;  %s2542_s30 = scalar_lea.hbm %s3721_s2, 256  ;;  %s502_s22 = int_to_ptr.hbm [resolvable:$true] %s501_s22 }
  0x32   : > { %s2535_s17 = sshra.s32 %s502_s22, 4  ;;  %s2536_s17 = int_to_ptr.hbm [resolvable:$true] %s2535_s17 }
  0x33   : > { %s2537_s25 = scalar_lea.hbm %s2536_s17, 128  ;;  %p2543_p5 = scmp.lt.s32.totalorder %s2536_s17, %s3721_s2 }
  0x34   : > { %p2538_p2 = scmp.ne.s32.totalorder %s2536_s17, %s2537_s25  ;;  %p2544_p7 = scmp.lt.s32.totalorder %s2542_s30, %s2537_s25 }
  0x36   : > { %p2540_p13 = pnand %p2539_p12, %p2538_p2  ;;  %p2545_p11 = por %p2544_p7, %p2543_p5 }
  0x38   : > { %p2541_p0 = pneg %p2540_p13 }
  0x3a   : > { %p2546_p1 = pnand %p2545_p11, %p2541_p0 }
  0x3c   : > { %2549 = shalt.err (!%p2546_p1)
}
  0x3d   : > { %s2773_s15 = smov 128   ;;  %s2774_s16 = smov 8  }
  0x3e   : > { %2380 = dma.hbm_to_vmem [thread:$0]  (!%p2954_p9), %s502_s22, 2048, %s504_s28, %s2964_s12, %s2773_s15, %s2773_s15, %s2774_s16  }
  0x3f   : > { %s3722_s10 = sld [smem:[#allocation34_spill]]  ;;  %s2775_s17 = smov [#allocation15]  }
  0x40   : > { %s441_s25 = sshll.u32 %s2775_s17, 4  ;;  %s3723_s30 = smov 4   ;;  %s442_s25 = int_to_ptr.vmem [resolvable:$true] %s441_s25 }
  0x41   : > { %s3724_s27 = smov 64   ;;  %s2989_s5 = sshll.u32 %s2950_s24, 3 }
  0x42   : > { %s2992_s2 = sshll.u32 %s2767_s19, 3  ;;  %s475_s6 = scalar_lea.vmem [#allocation4], %s2989_s5 }
  0x43   : > { %s479_s16 = scalar_lea.hbm %s3674_s1, %s2992_s2  ;;  %s483_s23 = sshll.u32 %s475_s6, 4  ;;  %s484_s23 = int_to_ptr.vmem [resolvable:$true] %s483_s23 }
  0x44   : > { %s481_s15 = sshll.u32 %s479_s16, 4  ;;  %s472_s29 = scalar_lea.sflag [#allocation5], %s2950_s24  ;;  %s482_s15 = int_to_ptr.hbm [resolvable:$true] %s481_s15 }
  0x45   : > { %s439_s14 = sshll.u32 %s3722_s10, 4  ;;  %s2595_s17 = sshra.s32 %s482_s15, 4  ;;  %s440_s14 = int_to_ptr.hbm [resolvable:$true] %s439_s14  ;;  %s2596_s17 = int_to_ptr.hbm [resolvable:$true] %s2595_s17 }
  0x46   : > { %2373 = dma.hbm_to_vmem [thread:$0]  (!%p2912_p10), %s440_s14, 256, %s442_s25, [#allocation14], %s3724_s27, %s3724_s27, %s3723_s30  }
  0x47   : > { %s2597_s10 = scalar_lea.hbm %s2596_s17, 8  ;;  %s2602_s30 = scalar_lea.hbm %s3674_s1, 16 }
  0x48   : > { %p2598_p1 = scmp.ne.s32.totalorder %s2596_s17, %s2597_s10  ;;  %p2603_p2 = scmp.lt.s32.totalorder %s2596_s17, %s3674_s1 }
  0x49   : > { %p2604_p13 = scmp.lt.s32.totalorder %s2602_s30, %s2597_s10 }
  0x4a   : > { %p2600_p10 = pnand %p2598_p1, %p2539_p12 }
  0x4b   : > { %p2605_p0 = por %p2604_p13, %p2603_p2 }
  0x4c   : > { %p2601_p11 = pneg %p2600_p10 }
  0x4e   : > { %p2606_p5 = pnand %p2605_p0, %p2601_p11 }
  0x50   : > { %2609 = shalt.err (!%p2606_p5)
}
  0x51   : > { %2377 = dma.hbm_to_vmem [thread:$0]  (!%p2954_p9), %s482_s15, 128, %s484_s23, %s472_s29  }
  0x52   : > { %s521_s16 = scalar_lea.hbm %s3676_s3, %s2992_s2  ;;  %s517_s14 = scalar_lea.vmem [#allocation9], %s2989_s5 }
  0x53   : > { %s523_s6 = sshll.u32 %s521_s16, 4  ;;  %s525_s25 = sshll.u32 %s517_s14, 4  ;;  %s524_s6 = int_to_ptr.hbm [resolvable:$true] %s523_s6  ;;  %s526_s25 = int_to_ptr.vmem [resolvable:$true] %s525_s25 }
  0x54   : > { %s2625_s17 = sshra.s32 %s524_s6, 4  ;;  %s2632_s15 = scalar_lea.hbm %s3676_s3, 16  ;;  %s2626_s17 = int_to_ptr.hbm [resolvable:$true] %s2625_s17 }
  0x55   : > { %s2627_s10 = scalar_lea.hbm %s2626_s17, 8  ;;  %p2633_p11 = scmp.lt.s32.totalorder %s2626_s17, %s3676_s3 }
  0x56   : > { %p2628_p7 = scmp.ne.s32.totalorder %s2626_s17, %s2627_s10  ;;  %p2634_p2 = scmp.lt.s32.totalorder %s2632_s15, %s2627_s10 }
  0x58   : > { %p2630_p1 = pnand %p2628_p7, %p2539_p12  ;;  %p2635_p13 = por %p2634_p2, %p2633_p11 }
  0x5a   : > { %p2631_p10 = pneg %p2630_p1 }
  0x5c   : > { %p2636_p0 = pnand %p2635_p13, %p2631_p10 }
  0x5e   : > { %2639 = shalt.err (!%p2636_p0)
}
  0x5f   : > { %2383 = dma.hbm_to_vmem [thread:$0]  (!%p2954_p9), %s524_s6, 128, %s526_s25, %s2964_s12  }
  0x60   : > { %s540_s28 = scalar_lea.hbm %s3677_s4, %s2992_s2  ;;  %s536_s16 = scalar_lea.vmem [#allocation10], %s2989_s5 }
  0x61   : > { %s544_s14 = sshll.u32 %s536_s16, 4  ;;  %s542_s30 = sshll.u32 %s540_s28, 4  ;;  %s545_s14 = int_to_ptr.vmem [resolvable:$true] %s544_s14  ;;  %s543_s30 = int_to_ptr.hbm [resolvable:$true] %s542_s30 }
  0x62   : > { %s3725_s17 = sand.u32 1, %s2767_s19   ;;  %s2655_s27 = sshra.s32 %s543_s30, 4  ;;  %s2656_s27 = int_to_ptr.hbm [resolvable:$true] %s2655_s27 }
  0x63   : > { %s533_s10 = scalar_lea.sflag [#allocation11], %s3725_s17  ;;  %s2657_s15 = scalar_lea.hbm %s2656_s27, 8 }
  0x64   : > { %p2658_p5 = scmp.ne.s32.totalorder %s2656_s27, %s2657_s15  ;;  %s2662_s25 = scalar_lea.hbm %s3677_s4, 16 }
  0x65   : > { %p2663_p10 = scmp.lt.s32.totalorder %s2656_s27, %s3677_s4  ;;  %p2664_p11 = scmp.lt.s32.totalorder %s2662_s25, %s2657_s15 }
  0x66   : > { %p2660_p7 = pnand %p2658_p5, %p2539_p12 }
  0x67   : > { %p2665_p2 = por %p2664_p11, %p2663_p10 }
  0x68   : > { %p2661_p1 = pneg %p2660_p7 }
  0x6a   : > { %p2666_p13 = pnand %p2665_p2, %p2661_p1 }
  0x6c   : > { %2669 = shalt.err (!%p2666_p13)
}
  0x6d   : > { %2386 = dma.hbm_to_vmem [thread:$0]  (!%p2954_p9), %s543_s30, 128, %s545_s14, %s533_s10  }
  0x6e   : > { %553 = sbr.rel (%p2904_p8) target bundleno = 1152 (0x480), region = 76 }
  0x73   : > { %s3049_s23 = sand.u32 1, %s2759_s18  }
  0x74   : > { %s3052_s29 = sshll.u32 %s3049_s23, 3  ;;  %s556_s22 = scalar_lea.sflag [#allocation5], %s3049_s23 }
  0x75   : > { %s559_s24 = scalar_lea.vmem [#allocation4], %s3052_s29 }
  0x76   : > { %2730 = dma.done.wait (%p2891_p4), %s556_s22, 128  }
  0x77   : > { %2732 = vsyncadd (%p2891_p4), %s556_s22, 4294967168  ;;  %s565_s26 = sand.u32 1, %s2882_s13   ;;  %s2230_s20 = sshll.u32 %s3049_s23, 7 }
  0x78   : > { %s566_s28 = scalar_lea.sflag [#allocation8], %s565_s26  ;;  %s3062_s16 = scalar_lea.vmem [#allocation7], %s2230_s20 }
  0x79   : > { %2734 = dma.done.wait (%p2891_p4), %s566_s28, 2176  }
  0x7a   : > { %2736 = vsyncadd (%p2891_p4), %s566_s28, 4294965120  ;;  %s579_s14 = scalar_lea.vmem [#allocation9], %s3052_s29  ;;  %s586_s30 = scalar_lea.sflag [#allocation11], %s565_s26 }
  0x7b   : > { %s589_s17 = scalar_lea.vmem [#allocation10], %s3052_s29 }
  0x7c   : > { %2738 = dma.done.wait (%p2891_p4), %s586_s30, 128  }
  0x7d   : > { %2740 = vsyncadd (%p2891_p4), %s586_s30, 4294967168  ;;  %p3726_p8 = scmp.eq.s32.totalorder %s2882_s13, 0 }
  0x7f   : > { %2742 = dma.done.wait (%p3726_p8), [#allocation11], 256   ;;  %p3727_p9 = pmov %p3726_p8 }
  0x80   : > { %p3728_p12 = pmov %p3726_p8 }
  0x81   : > { %2744 = vsyncadd (%p3727_p9), [#allocation11], 4294967040 }
  0x82   : > { %2746 = dma.done.wait (%p3728_p12), [#allocation14], 768   ;;  %p3729_p0 = pmov %p3726_p8 }
  0x83   : > { %v3700_v2 = vlaneseq  ;;  %p669_p5 = scmp.lt.s32.totalorder %s2882_s13, 1  ;;  %v3105_v13 = vld [vmem:[%s559_s24] sm:$0xff]  ;;  %v2470_v17 = vld [vmem:[#allocation2] ss:$0 sm:$0xff]  ;;  %v2776_v18 = vmov 0   ;;  %v3114_v21 = vld [vmem:[%s3062_s16 + $0x20] sm:$0xff] }
  0x84   : > { %2748 = vsyncadd (%p3729_p0), [#allocation14], 4294966528  ;;  %v1469_v14 = vperm.slane %v3105_v13, 0  ;;  %v1482_v16 = vperm.slane %v3105_v13, 1  ;;  %v1495_v19 = vperm.slane %v3105_v13, 2  ;;  %v3117_v22 = vld [vmem:[%s3062_s16 + $0x28] sm:$0xff] }
  0x85   : > { %v3084_v3 = vshrl.u32 %v3700_v2, 7  ;;  %s670_s21 = scalar_select %p669_p5, %s2882_s13, 1  ;;  %v2471_v20 = vld [vmem:[#allocation3] ss:$0 sm:$0xff]  ;;  %v1042_v23 = vpack.c.bf16 %v3117_v22, %v3114_v21  ;;  %v3124_v24 = vld [vmem:[%s3062_s16 + $0x10] sm:$0xff]  ;;  %v3127_v25 = vld [vmem:[%s3062_s16 + $0x18] sm:$0xff] }
  0x86   : > { %v1041_v26 = vpack.c.bf16 %v3127_v25, %v3124_v24  ;;  %v1508_v27 = vperm.slane %v3105_v13, 3  ;;  %v3135_v28 = vld [vmem:[%s3062_s16] sm:$0xff]  ;;  %v3138_v29 = vld [vmem:[%s3062_s16 + $0x8] sm:$0xff]  ;;  %v3143_v31 = vld [vmem:[%s3062_s16 + $0x38] sm:$0xff]  ;;  %v1521_v38 = vperm.slane %v3105_v13, 4  ;;  %v1534_v41 = vperm.slane %v3105_v13, 5 }
  0x87   : > { %2443 = vset.pattern.permute.xlu1 %v3084_v3  ;;  %2442 = vset.pattern.permute.xlu0 %v3084_v3  ;;  %s2237_s10 = sshll.u32 %s670_s21, 3  ;;  %v3094_v8 = vadd.s32 8, %v3084_v3  ;;  %v1040_v30 = vpack.c.bf16 %v3138_v29, %v3135_v28  ;;  %v3146_v32 = vld [vmem:[%s3062_s16 + $0x30] sm:$0xff]  ;;  %v3149_v33 = vld [vmem:[%s3062_s16 + $0x60] sm:$0xff]  ;;  %v3152_v34 = vld [vmem:[%s3062_s16 + $0x68] sm:$0xff]  ;;  %vm812_vm0 = vcmask 261120  }
  0x88   : > { %2444 = vset.pattern.permute.xlu2 %v3084_v3  ;;  %s672_s12 = scalar_lea.vmem %s3673_s0, %s2237_s10  ;;  %v1043_v36 = vpack.c.bf16 %v3143_v31, %v3146_v32  ;;  %v1046_v37 = vpack.c.bf16 %v3152_v34, %v3149_v33  ;;  %v2329_v43 = vld [vmem:[#allocation12 + $0x8] sm:$0xff]  ;;  %v3162_v44 = vld [vmem:[%s3062_s16 + $0x40] sm:$0xff]  ;;  %v3174_v53 = vld [vmem:[%s3062_s16 + $0x50] sm:$0xff]  ;;  %vm928_vm1 = vcmask 1041409   ;;  %vm930_vm2 = vcmask 1042434   ;;  %s2777_s6 = smov 32  }
  0x89   : > { %v691_v4 = vld [vmem:[%s672_s12] sm:$0xff]  ;;  %913 = vmatpush.bf16.msra.mxu0 %v2329_v43  ;;  %v2328_v49 = vld [vmem:[#allocation12] sm:$0xff]  ;;  %v3177_v54 = vld [vmem:[%s3062_s16 + $0x58] sm:$0xff]  ;;  %vm932_vm3 = vcmask 1043459   ;;  %vm934_vm4 = vcmask 1044484   ;;  %vm936_vm5 = vcmask 1045509  }
  0x8a   : > { %v705_v5 = vperm.slane %v691_v4, 1  ;;  %v692_v6 = vperm.slane %v691_v4, 0  ;;  %v718_v7 = vperm.slane %v691_v4, 2  ;;  %v744_v9 = vperm.slane %v691_v4, 4  ;;  %v3165_v45 = vld [vmem:[%s3062_s16 + $0x48] sm:$0xff]  ;;  %s2778_s20 = smov 96  }
  0x8b   : > { %v731_v10 = vperm.slane %v691_v4, 3  ;;  %v770_v11 = vperm.slane %v691_v4, 6  ;;  %v757_v12 = vperm.slane %v691_v4, 5  ;;  %v783_v15 = vperm.slane %v691_v4, 7  ;;  %v885_v51 = vld [vmem:[%s579_s14] sm:$0xff]  ;;  %s2323_s21 = sshll.u32 %s2882_s13, 3 }
  0x8c   : > { %v1044_v48 = vpack.c.bf16 %v3165_v45, %v3162_v44  ;;  %v886_v52 = vpack.c.bf16 %v885_v51, %v885_v51  ;;  %v1045_v56 = vpack.c.bf16 %v3177_v54, %v3174_v53  ;;  %vm938_vm6 = vcmask 1046534   ;;  %s3734_s13 = sld [smem:[#allocation35_spill]]  ;;  %s668_s12 = scalar_lea.vmem [#allocation16], %s3052_s29 }
  0x8d   : > { %914 = vmatpush.bf16.msra.mxu0 %v2328_v49  ;;  %vm940_vm7 = vcmask 1047559   ;;  %vm983_vm8 = vcmask 523264   ;;  %vm1879_vm9 = vcmask 392512   ;;  %vm1978_vm10 = vcmask 523712   ;;  %s2021_s5 = scalar_lea.sflag [#allocation6], %s3049_s23 }
  0x8e   : > { %vm2014_vm11 = vcmask 392192   ;;  %vm2017_vm12 = vcmask 588800  }
  0x8f   : > { %710 = vperm.xlu1 %2443, %v705_v5   ;;  %697 = vperm.xlu0 %2442, %v692_v6  }
  0x90   : > { %723 = vperm.xlu2 %2444, %v718_v7   ;;  %2246 = vmatmul.msk.bf16.vlgmr.msra.gmra.mxu0 %vm812_vm0, %v886_v52 }
  0x92   : > { %s2031_s15 = scalar_lea.hbm %s3734_s13, %s2323_s21 }
  0x93   : > { %s2035_s25 = sshll.u32 %s2031_s15, 4  ;;  %s2036_s25 = int_to_ptr.hbm [resolvable:$true] %s2035_s25 }
  0x94   : > { %s2699_s22 = sshra.s32 %s2036_s25, 4  ;;  %s2700_s22 = int_to_ptr.hbm [resolvable:$true] %s2699_s22 }
  0x95   : > { %s2701_s29 = scalar_lea.hbm %s2700_s22, 8  ;;  %p2706_p10 = scmp.lt.s32.totalorder %s2700_s22, %s3734_s13 }
  0x96   : > { %p2702_p4 = scmp.ne.s32.totalorder %s2700_s22, %s2701_s29 }
  0x97   : > { %2445 = vset.pattern.permute.xlu1 %v3094_v8  ;;  %749 = vperm.xlu0 %2442, %v744_v9  }
  0x98   : > { %2447 = vset.pattern.permute.xlu2 %v3094_v8  ;;  %p2703_p7 = pnand %p2702_p4, %p2941_p3 }
  0x9a   : > { %p2704_p1 = pneg %p2703_p7 }
  0x9f   : > { %716 = vperm.xlu1 %2445, %v705_v5   ;;  %2448 = vset.pattern.permute.xlu0 %v3094_v8  ;;  %v1560_v5 = vperm.slane %v3105_v13, 7 }
  0xa0   : > { %729 = vperm.xlu2 %2447, %v718_v7  }
  0xa7   : > { %2446 = vset.pattern.permute.xlu1 %v3084_v3  ;;  %703 = vperm.xlu0 %2448, %v692_v6  }
  0xa8   : > { %742 = vperm.xlu2 %2447, %v731_v10  }
  0xaf   : > { %736 = vperm.xlu1 %2446, %v731_v10   ;;  %781 = vperm.xlu0 %2448, %v770_v11  }
  0xb0   : > { %2450 = vset.pattern.permute.xlu2 %v3084_v3 }
  0xb7   : > { %2449 = vset.pattern.permute.xlu1 %v3094_v8  ;;  %2454 = vset.pattern.permute.xlu0 %v3084_v3 }
  0xb8   : > { %762 = vperm.xlu2 %2450, %v757_v12  }
  0xbf   : > { %755 = vperm.xlu1 %2449, %v744_v9   ;;  %1474 = vperm.xlu0 %2454, %v1469_v14  }
  0xc0   : > { %775 = vperm.xlu2 %2450, %v770_v11  }
  0xc7   : > { %768 = vperm.xlu1 %2449, %v757_v12   ;;  %v3196_v12 = vld [vmem:[%s3062_s16 + $0x78] sm:$0xff] }
  0xc8   : > { %2452 = vset.pattern.permute.xlu2 %v3094_v8 }
  0xcf   : > { %2451 = vset.pattern.permute.xlu1 %v3084_v3 }
  0xd0   : > { %794 = vperm.xlu2 %2452, %v783_v15  }
  0xd7   : > { %788 = vperm.xlu1 %2451, %v783_v15  }
  0xd8   : > { %1480 = vperm.xlu2 %2452, %v1469_v14   ;;  %v3199_v14 = vld [vmem:[%s3062_s16 + $0x70] sm:$0xff] }
  0xdf   : > { %2453 = vset.pattern.permute.xlu1 %v2776_v18 }
  0xe0   : > { %1493 = vperm.xlu2 %2452, %v1482_v16   ;;  %1281 = vperm.xlu1 %2453, %v2470_v17   ;;  %v1047_v17 = vpack.c.bf16 %v3196_v12, %v3199_v14 }
  0xe8   : > { %1506 = vperm.xlu2 %2452, %v1495_v19   ;;  %1416 = vperm.xlu1 %2453, %v2471_v20  }
  0xea   : > { %v724_v35 = vpop.permute.xlu2 %723 }
  0xeb   : > { %v800_v6 = vmul.f32 %v724_v35, %v3114_v21 }
  0xf0   : > { %2455 = vset.pattern.permute.xlu1 %v3084_v3  ;;  %2456 = vset.pattern.permute.xlu2 %v3084_v3 }
  0xf8   : > { %1487 = vperm.xlu1 %2455, %v1482_v16   ;;  %1526 = vperm.xlu2 %2456, %v1521_v38  }
  0xfa   : > { %v730_v42 = vpop.permute.xlu2 %729 }
  0xfb   : > { %v801_v7 = vmul.f32 %v730_v42, %v3117_v22  ;;  %v891_v22 = vld [vmem:[%s589_s17] sm:$0xff]  ;;  %s2779_s17 = smov 64  }
 0x100   : > { %1500 = vperm.xlu1 %2455, %v1495_v19   ;;  %1539 = vperm.xlu2 %2456, %v1534_v41  }
 0x101   : > { %v698_v39 = vpop.permute.xlu0 %697  ;;  %v711_v40 = vpop.permute.xlu1 %710 }
 0x102   : > { %v743_v50 = vpop.permute.xlu2 %742  ;;  %v796_v59 = vmul.f32 %v698_v39, %v3135_v28  ;;  %v798_v62 = vmul.f32 %v711_v40, %v3124_v24  ;;  %v832_v39 = vsel %vm812_vm0, %v801_v7, 0.0 }
 0x103   : > { %v803_v11 = vmul.f32 %v743_v50, %v3143_v31 }
 0x104   : > { %v813_v0 = vsel %vm812_vm0, %v796_v59, 0.0  ;;  %v822_v19 = vsel %vm812_vm0, %v798_v62, 0.0 }
 0x105   : > { %v841_v43 = vsel %vm812_vm0, %v803_v11, 0.0 }
 0x108   : > { %1513 = vperm.xlu1 %2455, %v1508_v27   ;;  %2458 = vset.pattern.permute.xlu2 %v3094_v8 }
 0x109   : > { %v750_v47 = vpop.permute.xlu0 %749 }
 0x10a   : > { %v804_v15 = vmul.f32 %v750_v47, %v3162_v44 }
 0x10c   : > { %v849_v49 = vsel %vm812_vm0, %v804_v15, 0.0 }
 0x110   : > { %2457 = vset.pattern.permute.xlu1 %v3094_v8 }
 0x111   : > { %v717_v46 = vpop.permute.xlu1 %716 }
 0x112   : > { %v763_v58 = vpop.permute.xlu2 %762  ;;  %v799_v61 = vmul.f32 %v717_v46, %v3127_v25  ;;  %v2334_v25 = vld [vmem:[%s3681_s8] sm:$0xff] }
 0x113   : > { %v806_v46 = vmul.f32 %v763_v58, %v3174_v53 }
 0x114   : > { %v823_v10 = vsel %vm812_vm0, %v799_v61, 0.0 }
 0x115   : > { %v824_v40 = vadd.f32 %v823_v10, %v822_v19  ;;  %v858_v62 = vsel %vm812_vm0, %v806_v46, 0.0 }
 0x117   : > { %v825_v61 = vrot.slane %v824_v40, 4 }
 0x118   : > { %1532 = vperm.xlu1 %2457, %v1521_v38   ;;  %v831_v38 = vsel %vm812_vm0, %v800_v6, 0.0 }
 0x119   : > { %v704_v57 = vpop.permute.xlu0 %703  ;;  %v826_v10 = vadd.f32 %v825_v61, %v824_v40 }
 0x11a   : > { %v797_v60 = vmul.f32 %v704_v57, %v3138_v29  ;;  %v833_v57 = vadd.f32 %v832_v39, %v831_v38 }
 0x11b   : > { %v827_v39 = vrot.slane %v826_v10, 2 }
 0x11c   : > { %v814_v1 = vsel %vm812_vm0, %v797_v60, 0.0  ;;  %v834_v7 = vrot.slane %v833_v57, 4 }
 0x11d   : > { %v815_v16 = vadd.f32 %v814_v1, %v813_v0 }
 0x11f   : > { %v816_v50 = vrot.slane %v815_v16, 4 }
 0x120   : > { %1545 = vperm.xlu1 %2457, %v1534_v41   ;;  %v776_v41 = vpop.permute.xlu2 %775 }
 0x121   : > { %v737_v55 = vpop.permute.xlu1 %736  ;;  %v782_v35 = vpop.permute.xlu0 %781  ;;  %v808_v47 = vmul.f32 %v776_v41, %v3149_v33  ;;  %v817_v0 = vadd.f32 %v816_v50, %v815_v16 }
 0x122   : > { %v802_v4 = vmul.f32 %v737_v55, %v3146_v32  ;;  %v809_v52 = vmul.f32 %v782_v35, %v3152_v34  ;;  %v835_v35 = vadd.f32 %v834_v7, %v833_v57 }
 0x123   : > { %v818_v19 = vrot.slane %v817_v0, 2 }
 0x124   : > { %v840_v20 = vsel %vm812_vm0, %v802_v4, 0.0  ;;  %v868_v4 = vsel %vm812_vm0, %v809_v52, 0.0  ;;  %v836_v16 = vrot.slane %v835_v35, 2  ;;  %v828_v52 = vadd.f32 %v827_v39, %v826_v10 }
 0x125   : > { %v842_v51 = vadd.f32 %v841_v43, %v840_v20  ;;  %v819_v43 = vadd.f32 %v818_v19, %v817_v0 }
 0x127   : > { %v843_v1 = vrot.slane %v842_v51, 4  ;;  %v820_v40 = vrot.slane %v819_v43, 1 }
 0x128   : > { %2459 = vset.pattern.permute.xlu1 %v3084_v3 }
 0x129   : > { %v844_v20 = vadd.f32 %v843_v1, %v842_v51 }
 0x12b   : > { %v845_v46 = vrot.slane %v844_v20, 2 }
 0x12d   : > { %v846_v61 = vadd.f32 %v845_v46, %v844_v20 }
 0x12f   : > { %v847_v7 = vrot.slane %v846_v61, 1 }
 0x130   : > { %1565 = vperm.xlu1 %2459, %v1560_v5  }
 0x131   : > { %v756_v63 = vpop.permute.xlu1 %755 }
 0x132   : > { %v805_v9 = vmul.f32 %v756_v63, %v3165_v45  ;;  %v867_v63 = vsel %vm812_vm0, %v808_v47, 0.0  ;;  %v795_v47 = vpop.permute.xlu2 %794 }
 0x133   : > { %v869_v15 = vadd.f32 %v868_v4, %v867_v63  ;;  %v837_v63 = vadd.f32 %v836_v16, %v835_v35 }
 0x134   : > { %v850_v42 = vsel %vm812_vm0, %v805_v9, 0.0 }
 0x135   : > { %v851_v59 = vadd.f32 %v850_v42, %v849_v49  ;;  %v870_v42 = vrot.slane %v869_v15, 4  ;;  %v811_v49 = vmul.f32 %v795_v47, %v3196_v12  ;;  %v838_v10 = vrot.slane %v837_v63, 1 }
 0x137   : > { %v852_v9 = vrot.slane %v851_v59, 4  ;;  %v877_v51 = vsel %vm812_vm0, %v811_v49, 0.0  ;;  %v839_v46 = vadd.f32 %v838_v10, %v837_v63 }
 0x139   : > { %v769_v55 = vpop.permute.xlu1 %768  ;;  %v853_v38 = vadd.f32 %v852_v9, %v851_v59 }
 0x13a   : > { %v807_v60 = vmul.f32 %v769_v55, %v3177_v54 }
 0x13b   : > { %v854_v50 = vrot.slane %v853_v38, 2 }
 0x13c   : > { %v859_v58 = vsel %vm812_vm0, %v807_v60, 0.0  ;;  %v871_v60 = vadd.f32 %v870_v42, %v869_v15 }
 0x13d   : > { %v860_v6 = vadd.f32 %v859_v58, %v858_v62  ;;  %v855_v57 = vadd.f32 %v854_v50, %v853_v38  ;;  %v829_v58 = vrot.slane %v828_v52, 1  ;;  %v848_v38 = vadd.f32 %v847_v7, %v846_v61 }
 0x13e   : > { %v872_v1 = vrot.slane %v871_v60, 2 }
 0x13f   : > { %v861_v11 = vrot.slane %v860_v6, 4  ;;  %v830_v15 = vadd.f32 %v829_v58, %v828_v52 }
 0x140   : > { %v873_v35 = vadd.f32 %v872_v1, %v871_v60 }
 0x141   : > { %v862_v41 = vadd.f32 %v861_v11, %v860_v6  ;;  %v821_v6 = vadd.f32 %v820_v40, %v819_v43  ;;  %v856_v11 = vrot.slane %v855_v57, 1 }
 0x142   : > { %v874_v43 = vrot.slane %v873_v35, 1 }
 0x143   : > { %v863_v55 = vrot.slane %v862_v41, 2  ;;  %v929_v39 = vsel %vm928_vm1, %v830_v15, %v821_v6  ;;  %v2331_v6 = vld [vmem:[#allocation13 + $0x8] sm:$0xff] }
 0x144   : > { %v931_v49 = vsel %vm930_vm2, %v839_v46, %v929_v39  ;;  %v875_v61 = vadd.f32 %v874_v43, %v873_v35  ;;  %v1547_v39 = vperm.slane %v3105_v13, 6  ;;  %v2336_v46 = vld [vmem:[#allocation15] sm:$0xff] }
 0x145   : > { %v864_v0 = vadd.f32 %v863_v55, %v862_v41  ;;  %v857_v41 = vadd.f32 %v856_v11, %v855_v57  ;;  %v933_v52 = vsel %vm932_vm3, %v848_v38, %v931_v49  ;;  %v916_v11 = vpop.f32.mrf.mxu0  ;;  %v2337_v38 = vld [vmem:[#allocation15 + $0x8] sm:$0xff] }
 0x146   : > { %1558 = vperm.xlu2 %2458, %v1547_v39   ;;  %2338 = vmatpush.bf16.msra.mxu2 %v2337_v38 }
 0x147   : > { %v865_v19 = vrot.slane %v864_v0, 1  ;;  %v935_v55 = vsel %vm934_vm4, %v857_v41, %v933_v52  ;;  %2339 = vmatpush.bf16.msra.mxu3 %v2337_v38  ;;  %1094 = vmatpush.bf16.msrb.mxu0 %v2337_v38 }
 0x148   : > { %1552 = vperm.xlu0 %2454, %v1547_v39  }
 0x149   : > { %v789_v62 = vpop.permute.xlu1 %788  ;;  %v866_v47 = vadd.f32 %v865_v19, %v864_v0  ;;  %v2333_v0 = vld [vmem:[#allocation13 + $0x18] sm:$0xff] }
 0x14a   : > { %v810_v59 = vmul.f32 %v789_v62, %v3199_v14  ;;  %v1605_v62 = vsub.f32 1.0, %v3105_v13  ;;  %991 = vmatpush.bf16.msra.mxu1 %v2333_v0  ;;  %2340 = vmatpush.bf16.msra.mxu2 %v2336_v46 }
 0x14b   : > { %v937_v40 = vsel %vm936_vm5, %v866_v47, %v935_v55  ;;  %2341 = vmatpush.bf16.msra.mxu3 %v2336_v46  ;;  %1095 = vmatpush.bf16.msrb.mxu0 %v2336_v46 }
 0x14c   : > { %v876_v4 = vsel %vm812_vm0, %v810_v59, 0.0  ;;  %v3236_v59 = vmul.f32 -1e+09, %v1605_v62 }
 0x14d   : > { %v878_v9 = vadd.f32 %v877_v51, %v876_v4  ;;  %v939_v51 = vsel %vm938_vm6, %v875_v61, %v937_v40  ;;  %v2332_v4 = vld [vmem:[#allocation13 + $0x10] sm:$0xff]  ;;  %v918_v19 = vpop.f32.mrf.mxu0  ;;  %2284 = vmatmul.msk.bf16.vlgmr.msra.gmra.mxu2 %vm812_vm0, %v1042_v23  ;;  %v917_v23 = vadd.f32 %v916_v11, %v891_v22 }
 0x14e   : > { %v1608_v58 = vperm.slane %v3236_v59, 0  ;;  %992 = vmatpush.bf16.msra.mxu1 %v2332_v4  ;;  %v1634_v47 = vperm.slane %v3236_v59, 2  ;;  %1571 = vperm.xlu2 %2458, %v1560_v5   ;;  %v1660_v28 = vperm.slane %v3236_v59, 4  ;;  %v1686_v13 = vperm.slane %v3236_v59, 6  ;;  %v3353_v4 = vpop.permute.xlu0 %1474 }
 0x14f   : > { %v879_v20 = vrot.slane %v878_v9, 4  ;;  %2287 = vmatmul.msk.bf16.vlgmr.msra.gmra.mxu3 %vm812_vm0, %v1045_v56  ;;  %2282 = vmatmul.msk.bf16.vlgmr.msrb.gmra.mxu0 %vm812_vm0, %v1040_v30  ;;  %v1673_v30 = vperm.slane %v3236_v59, 5  ;;  %v1699_v24 = vperm.slane %v3236_v59, 7 }
 0x151   : > { %v880_v42 = vadd.f32 %v879_v20, %v878_v9  ;;  %v2330_v20 = vld [vmem:[#allocation13] sm:$0xff] }
 0x152   : > { %v3240_v1 = vpop.permute.xlu1 %1281  ;;  %993 = vmatpush.bf16.msra.mxu1 %v2331_v6 }
 0x153   : > { %v881_v16 = vrot.slane %v880_v42, 2 }
 0x155   : > { %v882_v50 = vadd.f32 %v881_v16, %v880_v42  ;;  %v1621_v42 = vperm.slane %v3236_v59, 1  ;;  %v1647_v16 = vperm.slane %v3236_v59, 3 }
 0x156   : > { %994 = vmatpush.bf16.msra.mxu1 %v2330_v20  ;;  %2460 = vset.pattern.permute.xlu2 %v3084_v3 }
 0x157   : > { %v883_v60 = vrot.slane %v882_v50, 1  ;;  %1652 = vperm.xlu0 %2454, %v1647_v16  }
 0x159   : > { %v884_v63 = vadd.f32 %v883_v60, %v882_v50 }
 0x15a   : > { %v3242_v7 = vpop.permute.xlu1 %1416 }
 0x15b   : > { %v3233_v57 = vsel %vm940_vm7, %v884_v63, %v939_v51 }
 0x15c   : > { %3730 = vst [vmem:[#allocation29_spill] sm:$0xff] %v3233_v57  ;;  %942 = vrot.lane.b32.xlu1 %v3233_v57, %s2777_s6  ;;  %s2033_s6 = sshll.u32 %s668_s12, 4  ;;  %s2034_s6 = int_to_ptr.vmem [resolvable:$true] %s2033_s6 }
 0x15d   : > { %2285 = vmatmul.msk.bf16.gmra.mxu2 %vm812_vm0, %v1043_v36 }
 0x15e   : > { %1626 = vperm.xlu2 %2460, %v1621_v42  }
 0x15f   : > { %2462 = vset.pattern.permute.xlu0 %v3094_v8  ;;  %2288 = vmatmul.msk.bf16.gmra.mxu3 %vm812_vm0, %v1046_v37 }
 0x160   : > { %2283 = vmatmul.msk.bf16.gmra.mxu0 %vm812_vm0, %v1041_v26  ;;  %v3319_v26 = vpop.permute.xlu2 %1480 }
 0x164   : > { %1613 = vperm.xlu1 %2459, %v1608_v58  }
 0x166   : > { %1639 = vperm.xlu2 %2460, %v1634_v47  }
 0x167   : > { %1519 = vperm.xlu0 %2462, %v1508_v27  }
 0x168   : > { %v3321_v27 = vpop.permute.xlu2 %1493 }
 0x16a   : > { %v3244_v9 = vpop.permute.xlu1 %1487 }
 0x16c   : > { %2461 = vset.pattern.permute.xlu1 %v3094_v8 }
 0x16d   : > { %2286 = vmatmul.msk.bf16.gmra.mxu2 %vm812_vm0, %v1044_v48 }
 0x16e   : > { %2463 = vset.pattern.permute.xlu2 %v3094_v8 }
 0x16f   : > { %1619 = vperm.xlu0 %2462, %v1608_v58   ;;  %2289 = vmatmul.msk.bf16.gmra.mxu3 %vm812_vm0, %v1047_v17 }
 0x172   : > { %v3246_v10 = vpop.permute.xlu1 %1500 }
 0x174   : > { %1632 = vperm.xlu1 %2461, %v1621_v42  }
 0x176   : > { %1658 = vperm.xlu2 %2463, %v1647_v16  }
 0x177   : > { %1684 = vperm.xlu0 %2462, %v1673_v30  }
 0x17a   : > { %v3248_v15 = vpop.permute.xlu1 %1513 }
 0x17c   : > { %1645 = vperm.xlu1 %2461, %v1634_v47  }
 0x17e   : > { %1671 = vperm.xlu2 %2463, %v1660_v28  }
 0x17f   : > { %2467 = vset.pattern.permute.xlu0 %v2776_v18 }
 0x184   : > { %2464 = vset.pattern.permute.xlu1 %v3084_v3 }
 0x186   : > { %2465 = vset.pattern.permute.xlu2 %v3084_v3  ;;  %v3323_v3 = vpop.permute.xlu2 %1506 }
 0x18a   : > { %v3250_v35 = vpop.permute.xlu1 %1532 }
 0x18c   : > { %1665 = vperm.xlu1 %2464, %v1660_v28  }
 0x18e   : > { %1691 = vperm.xlu2 %2465, %v1686_v13   ;;  %v3328_v44 = vpop.permute.xlu2 %1526 }
 0x192   : > { %v3254_v41 = vpop.permute.xlu1 %1545 }
 0x194   : > { %1678 = vperm.xlu1 %2464, %v1673_v30  }
 0x196   : > { %1704 = vperm.xlu2 %2465, %v1699_v24   ;;  %v3335_v52 = vpop.permute.xlu2 %1539 }
 0x19c   : > { %2466 = vset.pattern.permute.xlu1 %v3094_v8  ;;  %v2335_v8 = vld [vmem:[%s3681_s8 + $0x8] sm:$0xff] }
 0x19d   : > { %1031 = vmatpush.bf16.msrb.mxu1 %v2335_v8 }
 0x19e   : > { %2468 = vset.pattern.permute.xlu2 %v2776_v18 }
 0x1a0   : > { %v3340_v62 = vpop.permute.xlu2 %1558 }
 0x1a1   : > { %1032 = vmatpush.bf16.msrb.mxu1 %v2334_v25 }
 0x1a2   : > { %v3272_v21 = vpop.permute.xlu1 %1565 }
 0x1a4   : > { %1697 = vperm.xlu1 %2466, %v1686_v13   ;;  %v3380_v13 = vld [vmem:[%s3684_s11] ss:$0 sm:$0xff] }
 0x1a8   : > { %v3343_v63 = vpop.permute.xlu2 %1571 }
 0x1ac   : > { %1710 = vperm.xlu1 %2466, %v1699_v24  }
 0x1b4   : > { %2469 = vset.pattern.permute.xlu1 %v2776_v18  ;;  %v2472_v18 = vld [vmem:[%s3680_s7] ss:$0 sm:$0xff] }
 0x1b8   : > { %v3345_v51 = vpop.permute.xlu2 %1626 }
 0x1ba   : > { %v3359_v19 = vpop.permute.xlu0 %1552 }
 0x1c0   : > { %v3347_v59 = vpop.permute.xlu2 %1639 }
 0x1c9   : > { %v3365_v38 = vpop.permute.xlu0 %1652 }
 0x1cc   : > { %v1097_v46 = vpop.f32.mrf.mxu0 }
 0x1ce   : > { %v943_v53 = vpop.permute.xlu1 %942 }
 0x1cf   : > { %v945_v54 = vsel %vm812_vm0, %v917_v23, %v943_v53 }
 0x1d0   : > { %v946_v29 = vpack.c.bf16 %v945_v54, %v945_v54  ;;  %v3351_v0 = vpop.permute.xlu2 %1658  ;;  %v3367_v42 = vpop.f32.mrf.mxu2 }
 0x1d2   : > { %2263 = vmatmul.msk.bf16.vlgmr.msra.gmra.mxu1 %vm983_vm8, %v946_v29  ;;  %v3382_v25 = vpop.f32.mrf.mxu3 }
 0x1d4   : > { %v1099_v53 = vpop.f32.mrf.mxu0 }
 0x1d6   : > { %v3349_v58 = vpop.permute.xlu1 %1613 }
 0x1d8   : > { %v3357_v11 = vpop.permute.xlu2 %1671  ;;  %v1109_v23 = vpop.f32.mrf.mxu2 }
 0x1d9   : > { %v3373_v22 = vpop.permute.xlu0 %1519 }
 0x1e6   : > { %v3355_v6 = vpop.permute.xlu1 %1632 }
 0x1e8   : > { %v3363_v39 = vpop.permute.xlu2 %1691 }
 0x1ee   : > { %v3361_v20 = vpop.permute.xlu1 %1645 }
 0x1f0   : > { %v3371_v16 = vpop.permute.xlu2 %1704 }
 0x1fe   : > { %v3369_v47 = vpop.permute.xlu1 %1665 }
 0x206   : > { %v3375_v54 = vpop.permute.xlu1 %1678 }
 0x24f   : > { %v996_v31 = vpop.f32.mrf.mxu1 }
 0x250   : > { %v997_v32 = vadd.f32 %v2472_v18, %v996_v31 }
 0x252   : > { %v1145_v33 = vperm.slane %v997_v32, 0  ;;  %v1139_v34 = vrot.slane %v997_v32, 2  ;;  %v1138_v36 = vrot.slane %v997_v32, 1  ;;  %v1000_v37 = vmax.f32 %v997_v32, 0.0 }
 0x253   : > { %v1140_v5 = vrot.slane %v997_v32, 3  ;;  %v1142_v14 = vrot.slane %v997_v32, 5  ;;  %v1141_v17 = vrot.slane %v997_v32, 4  ;;  %v1143_v55 = vrot.slane %v997_v32, 6 }
 0x254   : > { %1153 = vrot.lane.b32.xlu2 %v1145_v33, %s2778_s20  ;;  %v1147_v45 = vperm.slane %v1139_v34, 0  ;;  %v1146_v48 = vperm.slane %v1138_v36, 0  ;;  %v1001_v56 = vpack.c.bf16 %v1000_v37, %v1000_v37  ;;  %v1144_v60 = vrot.slane %v997_v32, 7  ;;  %v3386_v32 = vpop.permute.xlu0 %1619  ;;  %v1112_v34 = vpop.f32.mrf.mxu2 }
 0x255   : > { %v1148_v43 = vperm.slane %v1140_v5, 0  ;;  %v1150_v49 = vperm.slane %v1142_v14, 0  ;;  %v1149_v50 = vperm.slane %v1141_v17, 0  ;;  %v1151_v40 = vperm.slane %v1143_v55, 0  ;;  %v3391_v36 = vpop.permute.xlu1 %1697  ;;  %v1124_v37 = vpop.f32.mrf.mxu3 }
 0x256   : > { %1157 = vrot.lane.b32.xlu1 %v1147_v45, %s2778_s20  ;;  %1155 = vrot.lane.b32.xlu0 %v1146_v48, %s2778_s20  ;;  %v1152_v61 = vperm.slane %v1144_v60, 0  ;;  %v1102_v45 = vpop.f32.mrf.mxu0 }
 0x257   : > { %2272 = vmatmul.msk.bf16.vlgmr.msrb.gmra.mxu1 %vm812_vm0, %v1001_v56  ;;  %v998_v12 = vpop.f32.mrf.mxu1 }
 0x25c   : > { %1159 = vrot.lane.b32.xlu2 %v1148_v43, %s2778_s20  ;;  %v3393_v48 = vpop.permute.xlu0 %1684  ;;  %v1114_v56 = vpop.f32.mrf.mxu2 }
 0x25d   : > { %v3395_v5 = vpop.permute.xlu1 %1710  ;;  %v1127_v12 = vpop.f32.mrf.mxu3 }
 0x25e   : > { %1163 = vrot.lane.b32.xlu1 %v1150_v49, %s2778_s20  ;;  %1161 = vrot.lane.b32.xlu0 %v1149_v50, %s2778_s20  ;;  %v1104_v14 = vpop.f32.mrf.mxu0 }
 0x264   : > { %1165 = vrot.lane.b32.xlu2 %v1151_v40, %s2778_s20  ;;  %v1117_v17 = vpop.f32.mrf.mxu2 }
 0x266   : > { %1167 = vrot.lane.b32.xlu0 %v1152_v61, %s2778_s20 }
 0x2ae   : > { %v1154_v28 = vpop.permute.xlu2 %1153 }
 0x2af   : > { %v1177_v29 = vadd.f32 %v1154_v28, %v1097_v46  ;;  %v1178_v30 = vadd.f32 %v1154_v28, %v1099_v53 }
 0x2b1   : > { %v1193_v24 = vmax.f32 %v1177_v29, 0.0  ;;  %v1194_v8 = vmax.f32 %v1178_v30, 0.0  ;;  %v1129_v30 = vpop.f32.mrf.mxu3 }
 0x2b3   : > { %v1213_v18 = vmul.f32 %v3380_v13, %v1193_v24  ;;  %v1214_v31 = vmul.f32 %v3380_v13, %v1194_v8 }
 0x2b5   : > { %1316 = vrot.lane.b32.xlu2 %v1213_v18, %s2778_s20  ;;  %1318 = vrot.lane.b32.xlu0 %v1214_v31, %s2778_s20  ;;  %v1229_v33 = vsel %vm812_vm0, %v1213_v18, 0.0  ;;  %v1119_v18 = vpop.f32.mrf.mxu2  ;;  %v1232_v2 = vsel %vm812_vm0, %v1214_v31, 0.0 }
 0x2b6   : > { %1230 = vadd.xlane.f32.xlu1 %v1229_v33  ;;  %v1160_v55 = vpop.permute.xlu2 %1159 }
 0x2b7   : > { %v1183_v46 = vadd.f32 %v1160_v55, %v1112_v34 }
 0x2b9   : > { %v1199_v24 = vmax.f32 %v1183_v46, 0.0 }
 0x2c8   : > { %v1156_v43 = vpop.permute.xlu0 %1155  ;;  %v1158_v60 = vpop.permute.xlu1 %1157 }
 0x2c9   : > { %v1179_v49 = vadd.f32 %v1156_v43, %v1102_v45  ;;  %v1180_v50 = vadd.f32 %v1156_v43, %v1104_v14  ;;  %v1182_v53 = vadd.f32 %v1158_v60, %v1109_v23  ;;  %v1219_v23 = vmul.f32 %v3380_v13, %v1199_v24 }
 0x2cb   : > { %v1195_v40 = vmax.f32 %v1179_v49, 0.0  ;;  %v1196_v61 = vmax.f32 %v1180_v50, 0.0  ;;  %v1198_v8 = vmax.f32 %v1182_v53, 0.0  ;;  %v1132_v49 = vpop.f32.mrf.mxu3 }
 0x2cd   : > { %v3398_v28 = vmul.f32 %v3380_v13, %v1196_v61  ;;  %v1215_v29 = vmul.f32 %v3380_v13, %v1195_v40  ;;  %v3408_v43 = vmul.f32 %v3380_v13, %v1198_v8  ;;  %v1166_v61 = vpop.permute.xlu2 %1165 }
 0x2cf   : > { %1322 = vrot.lane.b32.xlu0 %v3398_v28, %s2778_s20  ;;  %1320 = vrot.lane.b32.xlu1 %v1215_v29, %s2778_s20 }
 0x2d0   : > { %v1162_v33 = vpop.permute.xlu0 %1161  ;;  %v1164_v46 = vpop.permute.xlu1 %1163 }
 0x2d1   : > { %v1185_v14 = vadd.f32 %v1162_v33, %v1117_v17  ;;  %v1186_v34 = vadd.f32 %v1162_v33, %v1119_v18  ;;  %v1189_v17 = vadd.f32 %v1166_v61, %v1127_v12  ;;  %v1188_v18 = vadd.f32 %v1164_v46, %v1124_v37 }
 0x2d3   : > { %v1201_v50 = vmax.f32 %v1185_v14, 0.0  ;;  %v1202_v40 = vmax.f32 %v1186_v34, 0.0  ;;  %v1205_v33 = vmax.f32 %v1189_v17, 0.0  ;;  %v1204_v14 = vmax.f32 %v1188_v18, 0.0  ;;  %v1134_v34 = vpop.f32.mrf.mxu3 }
 0x2d4   : > { %v3404_v45 = vpop.f32.mrf.mxu1 }
 0x2d5   : > { %3731 = vst [vmem:[#allocation30_spill] sm:$0xff] %v3404_v45  ;;  %v1222_v24 = vmul.f32 %v3380_v13, %v1202_v40  ;;  %v3416_v8 = vmul.f32 %v3380_v13, %v1201_v50  ;;  %v1225_v31 = vmul.f32 %v3380_v13, %v1205_v33  ;;  %v1224_v37 = vmul.f32 %v3380_v13, %v1204_v14 }
 0x2d6   : > { %v1181_v50 = vadd.f32 %v1158_v60, %v3367_v42  ;;  %v1187_v14 = vadd.f32 %v1164_v46, %v3382_v25  ;;  %v1190_v60 = vadd.f32 %v1166_v61, %v1129_v30  ;;  %v1247_v25 = vsel %vm812_vm0, %v1219_v23, 0.0 }
 0x2d7   : > { %1328 = vrot.lane.b32.xlu0 %v1219_v23, %s2778_s20  ;;  %1326 = vrot.lane.b32.xlu1 %v3408_v43, %s2778_s20  ;;  %v1256_v30 = vsel %vm812_vm0, %v1222_v24, 0.0  ;;  %v1238_v23 = vsel %vm812_vm0, %v3398_v28, 0.0 }
 0x2d8   : > { %v1168_v57 = vpop.permute.xlu0 %1167  ;;  %v1203_v42 = vmax.f32 %v1187_v14, 0.0 }
 0x2d9   : > { %v1192_v45 = vadd.f32 %v1168_v57, %v1134_v34 }
 0x2da   : > { %v1223_v34 = vmul.f32 %v3380_v13, %v1203_v42 }
 0x2db   : > { %v1208_v12 = vmax.f32 %v1192_v45, 0.0 }
 0x2dc   : > { %v1036_v53 = vpop.f32.mrf.mxu1  ;;  %v1259_v61 = vsel %vm812_vm0, %v1223_v34, 0.0 }
 0x2dd   : > { %v1191_v53 = vadd.f32 %v1168_v57, %v1132_v49  ;;  %v1228_v40 = vmul.f32 %v3380_v13, %v1208_v12  ;;  %v1197_v57 = vmax.f32 %v1181_v50, 0.0  ;;  %v1184_v49 = vadd.f32 %v1160_v55, %v1114_v56 }
 0x2de   : > { %1233 = vadd.xlane.f32.xlu2 %v1232_v2  ;;  %v1235_v55 = vsel %vm812_vm0, %v1215_v29, 0.0 }
 0x2df   : > { %1334 = vrot.lane.b32.xlu0 %v1222_v24, %s2778_s20  ;;  %1332 = vrot.lane.b32.xlu1 %v3416_v8, %s2778_s20  ;;  %v1207_v2 = vmax.f32 %v1191_v53, 0.0  ;;  %v1217_v18 = vmul.f32 %v3380_v13, %v1197_v57  ;;  %v1200_v33 = vmax.f32 %v1184_v49, 0.0  ;;  %v1206_v53 = vmax.f32 %v1190_v60, 0.0 }
 0x2e0   : > { %v1274_v50 = vsel %vm812_vm0, %v1228_v40, 0.0  ;;  %v1244_v49 = vsel %vm812_vm0, %v3408_v43, 0.0 }
 0x2e1   : > { %v1227_v17 = vmul.f32 %v3380_v13, %v1207_v2  ;;  %v1220_v45 = vmul.f32 %v3380_v13, %v1200_v33  ;;  %v1226_v56 = vmul.f32 %v3380_v13, %v1206_v53  ;;  %v1241_v2 = vsel %vm812_vm0, %v1217_v18, 0.0 }
 0x2e2   : > { %v1265_v13 = vsel %vm812_vm0, %v1225_v31, 0.0  ;;  %v1253_v33 = vsel %vm812_vm0, %v3416_v8, 0.0 }
 0x2e3   : > { %v1250_v46 = vsel %vm812_vm0, %v1220_v45, 0.0  ;;  %v1268_v29 = vsel %vm812_vm0, %v1226_v56, 0.0 }
 0x2e7   : > { %1340 = vrot.lane.b32.xlu0 %v1225_v31, %s2778_s20  ;;  %1338 = vrot.lane.b32.xlu1 %v1224_v37, %s2778_s20 }
 0x2ef   : > { %1346 = vrot.lane.b32.xlu0 %v1228_v40, %s2778_s20  ;;  %1344 = vrot.lane.b32.xlu1 %v1227_v17, %s2778_s20 }
 0x2f6   : > { %1324 = vrot.lane.b32.xlu2 %v1217_v18, %s2778_s20 }
 0x2fe   : > { %1330 = vrot.lane.b32.xlu2 %v1220_v45, %s2778_s20  ;;  %v1262_v45 = vsel %vm812_vm0, %v1224_v37, 0.0 }
 0x306   : > { %1336 = vrot.lane.b32.xlu2 %v1223_v34, %s2778_s20  ;;  %v1271_v34 = vsel %vm812_vm0, %v1227_v17, 0.0 }
 0x30e   : > { %1342 = vrot.lane.b32.xlu2 %v1226_v56, %s2778_s20  ;;  %s2705_s20 = scalar_lea.hbm %s3734_s13, 16 }
 0x30f   : > { %v1317_v28 = vpop.permute.xlu2 %1316  ;;  %p2707_p11 = scmp.lt.s32.totalorder %s2705_s20, %s2701_s29 }
 0x310   : > { %v1364_v37 = vsel %vm812_vm0, %v1317_v28, 0.0 }
 0x311   : > { %p2708_p2 = por %p2707_p11, %p2706_p10 }
 0x313   : > { %p2709_p13 = pnand %p2708_p2, %p2704_p1 }
 0x319   : > { %1236 = vadd.xlane.f32.xlu0 %v1235_v55  ;;  %1242 = vadd.xlane.f32.xlu1 %v1241_v2 }
 0x321   : > { %1248 = vadd.xlane.f32.xlu0 %v1247_v25  ;;  %1251 = vadd.xlane.f32.xlu1 %v1250_v46 }
 0x327   : > { %v1319_v12 = vpop.permute.xlu0 %1318 }
 0x328   : > { %v1367_v57 = vsel %vm812_vm0, %v1319_v12, 0.0 }
 0x329   : > { %1257 = vadd.xlane.f32.xlu0 %v1256_v30  ;;  %1260 = vadd.xlane.f32.xlu1 %v1259_v61  ;;  %v1231_v24 = vpop.xlane.xlu1 %1230 }
 0x32a   : > { %v1284_v12 = vadd.f32 %v3240_v1, %v1231_v24 }
 0x331   : > { %1266 = vadd.xlane.f32.xlu0 %v1265_v13  ;;  %1269 = vadd.xlane.f32.xlu1 %v1268_v29 }
 0x337   : > { %1239 = vadd.xlane.f32.xlu2 %v1238_v23 }
 0x339   : > { %1275 = vadd.xlane.f32.xlu0 %v1274_v50  ;;  %1368 = vadd.xlane.f32.xlu1 %v1367_v57  ;;  %v2290_v50 = vclamps-f32 %v1284_v12, 5e+08 }
 0x33f   : > { %1245 = vadd.xlane.f32.xlu2 %v1244_v49 }
 0x341   : > { %v1321_v31 = vpop.permute.xlu1 %1320  ;;  %v1323_v55 = vpop.permute.xlu0 %1322 }
 0x342   : > { %v1370_v18 = vsel %vm812_vm0, %v1321_v31, 0.0  ;;  %v1373_v13 = vsel %vm812_vm0, %v1323_v55, 0.0 }
 0x343   : > { %1371 = vadd.xlane.f32.xlu0 %v1370_v18  ;;  %v1589_v18 = vmul.f32 %v2290_v50, %v3353_v4 }
 0x347   : > { %1254 = vadd.xlane.f32.xlu2 %v1253_v33 }
 0x349   : > { %v1327_v14 = vpop.permute.xlu1 %1326  ;;  %v1329_v61 = vpop.permute.xlu0 %1328 }
 0x34a   : > { %v1379_v40 = vsel %vm812_vm0, %v1327_v14, 0.0  ;;  %v1382_v57 = vsel %vm812_vm0, %v1329_v61, 0.0  ;;  %v1728_v14 = vadd.f32 %v3349_v58, %v1589_v18 }
 0x34b   : > { %1380 = vadd.xlane.f32.xlu0 %v1379_v40 }
 0x34f   : > { %1263 = vadd.xlane.f32.xlu2 %v1262_v45 }
 0x351   : > { %v1234_v42 = vpop.xlane.xlu2 %1233  ;;  %v1333_v60 = vpop.permute.xlu1 %1332 }
 0x352   : > { %v1388_v43 = vsel %vm812_vm0, %v1333_v60, 0.0  ;;  %v1335_v49 = vpop.permute.xlu0 %1334  ;;  %v1285_v55 = vadd.f32 %v3240_v1, %v1234_v42 }
 0x353   : > { %1389 = vadd.xlane.f32.xlu0 %v1388_v43  ;;  %v1391_v28 = vsel %vm812_vm0, %v1335_v49, 0.0 }
 0x357   : > { %1272 = vadd.xlane.f32.xlu2 %v1271_v34 }
 0x359   : > { %v1325_v53 = vpop.permute.xlu2 %1324  ;;  %v1339_v56 = vpop.permute.xlu1 %1338 }
 0x35a   : > { %v1376_v8 = vsel %vm812_vm0, %v1325_v53, 0.0  ;;  %v1397_v2 = vsel %vm812_vm0, %v1339_v56, 0.0  ;;  %v1341_v24 = vpop.permute.xlu0 %1340 }
 0x35b   : > { %1377 = vadd.xlane.f32.xlu1 %v1376_v8  ;;  %1398 = vadd.xlane.f32.xlu0 %v1397_v2  ;;  %v1400_v40 = vsel %vm812_vm0, %v1341_v24, 0.0 }
 0x35f   : > { %1365 = vadd.xlane.f32.xlu2 %v1364_v37 }
 0x361   : > { %v1331_v25 = vpop.permute.xlu2 %1330  ;;  %v1345_v46 = vpop.permute.xlu1 %1344 }
 0x362   : > { %v1385_v30 = vsel %vm812_vm0, %v1331_v25, 0.0  ;;  %v1406_v17 = vsel %vm812_vm0, %v1345_v46, 0.0  ;;  %v1347_v45 = vpop.permute.xlu0 %1346 }
 0x363   : > { %1386 = vadd.xlane.f32.xlu1 %v1385_v30  ;;  %1407 = vadd.xlane.f32.xlu0 %v1406_v17  ;;  %v1409_v60 = vsel %vm812_vm0, %v1347_v45, 0.0  ;;  %v2291_v30 = vclamps-f32 %v1285_v55, 5e+08 }
 0x367   : > { %1374 = vadd.xlane.f32.xlu2 %v1373_v13  ;;  %v1590_v13 = vmul.f32 %v2291_v30, %v3319_v26 }
 0x369   : > { %v1337_v29 = vpop.permute.xlu2 %1336  ;;  %v1729_v42 = vadd.f32 %v3386_v32, %v1590_v13 }
 0x36a   : > { %v1394_v23 = vsel %vm812_vm0, %v1337_v29, 0.0 }
 0x36b   : > { %1395 = vadd.xlane.f32.xlu1 %v1394_v23 }
 0x36f   : > { %1383 = vadd.xlane.f32.xlu2 %v1382_v57 }
 0x371   : > { %v1343_v31 = vpop.permute.xlu2 %1342 }
 0x372   : > { %v1403_v33 = vsel %vm812_vm0, %v1343_v31, 0.0 }
 0x373   : > { %1404 = vadd.xlane.f32.xlu1 %v1403_v33 }
 0x377   : > { %1392 = vadd.xlane.f32.xlu2 %v1391_v28  ;;  %1826 = vperm.xlu0 %2467, %v1728_v14  }
 0x37f   : > { %1401 = vadd.xlane.f32.xlu2 %v1400_v40 }
 0x387   : > { %1410 = vadd.xlane.f32.xlu2 %v1409_v60 }
 0x38c   : > { %v1237_v43 = vpop.xlane.xlu0 %1236  ;;  %v1243_v34 = vpop.xlane.xlu1 %1242 }
 0x38d   : > { %v1286_v53 = vadd.f32 %v3240_v1, %v1237_v43  ;;  %v1288_v8 = vadd.f32 %v3240_v1, %v1243_v34 }
 0x38f   : > { %v2292_v56 = vclamps-f32 %v1286_v53, 5e+08  ;;  %v2294_v37 = vclamps-f32 %v1288_v8, 5e+08 }
 0x391   : > { %v1591_v2 = vmul.f32 %v2292_v56, %v3244_v9  ;;  %v1593_v17 = vmul.f32 %v2294_v37, %v3246_v10 }
 0x393   : > { %v1730_v25 = vadd.f32 %v3345_v51, %v1591_v2  ;;  %v1732_v12 = vadd.f32 %v3347_v59, %v1593_v17 }
 0x394   : > { %v1252_v46 = vpop.xlane.xlu1 %1251  ;;  %v1249_v23 = vpop.xlane.xlu0 %1248 }
 0x395   : > { %1832 = vperm.xlu1 %2469, %v1730_v25   ;;  %v1291_v61 = vadd.f32 %v3240_v1, %v1252_v46  ;;  %v1290_v34 = vadd.f32 %v3240_v1, %v1249_v23 }
 0x397   : > { %v2297_v29 = vclamps-f32 %v1291_v61, 5e+08  ;;  %v2296_v2 = vclamps-f32 %v1290_v34, 5e+08 }
 0x399   : > { %v1596_v57 = vmul.f32 %v2297_v29, %v3373_v22  ;;  %v1595_v17 = vmul.f32 %v2296_v2, %v3248_v15 }
 0x39b   : > { %v1735_v18 = vadd.f32 %v3351_v0, %v1596_v57  ;;  %v1734_v23 = vadd.f32 %v3365_v38, %v1595_v17 }
 0x39c   : > { %v1261_v50 = vpop.xlane.xlu1 %1260  ;;  %v1258_v28 = vpop.xlane.xlu0 %1257 }
 0x39d   : > { %1838 = vperm.xlu1 %2469, %v1732_v12   ;;  %v1294_v49 = vadd.f32 %v3240_v1, %v1261_v50  ;;  %v1293_v61 = vadd.f32 %v3240_v1, %v1258_v28 }
 0x39f   : > { %1829 = vperm.xlu2 %2468, %v1729_v42   ;;  %v2300_v31 = vclamps-f32 %v1294_v49, 5e+08  ;;  %v2299_v12 = vclamps-f32 %v1293_v61, 5e+08 }
 0x3a1   : > { %v1599_v14 = vmul.f32 %v2300_v31, %v3335_v52  ;;  %v1598_v31 = vmul.f32 %v2299_v12, %v3250_v35 }
 0x3a3   : > { %v1738_v43 = vadd.f32 %v3375_v54, %v1599_v14 }
 0x3a4   : > { %v1270_v33 = vpop.xlane.xlu1 %1269  ;;  %v1267_v55 = vpop.xlane.xlu0 %1266 }
 0x3a5   : > { %1847 = vperm.xlu1 %2469, %v1735_v18   ;;  %v1297_v24 = vadd.f32 %v3240_v1, %v1270_v33  ;;  %v1296_v18 = vadd.f32 %v3240_v1, %v1267_v55 }
 0x3a7   : > { %v2303_v45 = vclamps-f32 %v1297_v24, 5e+08  ;;  %v2302_v14 = vclamps-f32 %v1296_v18, 5e+08  ;;  %v1737_v24 = vadd.f32 %v3357_v11, %v1598_v31 }
 0x3a9   : > { %v1602_v56 = vmul.f32 %v2303_v45, %v3340_v62  ;;  %v1601_v34 = vmul.f32 %v2302_v14, %v3359_v19 }
 0x3aa   : > { %v1240_v40 = vpop.xlane.xlu2 %1239 }
 0x3ab   : > { %v1287_v60 = vadd.f32 %v3240_v1, %v1240_v40  ;;  %v1741_v30 = vadd.f32 %v3391_v36, %v1602_v56 }
 0x3ac   : > { %v1276_v42 = vpop.xlane.xlu0 %1275 }
 0x3ad   : > { %v2293_v53 = vclamps-f32 %v1287_v60, 5e+08  ;;  %1856 = vperm.xlu1 %2469, %v1738_v43  }
 0x3af   : > { %v1592_v8 = vmul.f32 %v2293_v53, %v3321_v27  ;;  %v1299_v53 = vadd.f32 %v3240_v1, %v1276_v42 }
 0x3b1   : > { %v1731_v37 = vadd.f32 %v3355_v6, %v1592_v8  ;;  %v1369_v8 = vpop.xlane.xlu1 %1368  ;;  %v2305_v2 = vclamps-f32 %v1299_v53, 5e+08 }
 0x3b2   : > { %v1246_v25 = vpop.xlane.xlu2 %1245  ;;  %v1420_v12 = vadd.f32 %v3242_v7, %v1369_v8 }
 0x3b3   : > { %v1289_v46 = vadd.f32 %v3240_v1, %v1246_v25  ;;  %1835 = vperm.xlu2 %2468, %v1731_v37   ;;  %v1740_v37 = vadd.f32 %v3363_v39, %v1601_v34  ;;  %v1604_v61 = vmul.f32 %v2305_v2, %v3343_v63 }
 0x3b4   : > { %v2307_v31 = vclamps-f32 %v1420_v12, 5e+08 }
 0x3b5   : > { %v2295_v13 = vclamps-f32 %v1289_v46, 5e+08  ;;  %1865 = vperm.xlu1 %2469, %v1741_v30  }
 0x3b6   : > { %v1372_v45 = vpop.xlane.xlu0 %1371 }
 0x3b7   : > { %v1594_v29 = vmul.f32 %v2295_v13, %v3323_v3  ;;  %v1421_v13 = vadd.f32 %v3242_v7, %v1372_v45 }
 0x3b9   : > { %v1733_v50 = vadd.f32 %v3361_v20, %v1594_v29  ;;  %v2308_v42 = vclamps-f32 %v1421_v13, 5e+08 }
 0x3ba   : > { %v1255_v57 = vpop.xlane.xlu2 %1254 }
 0x3bb   : > { %v1292_v49 = vadd.f32 %v3240_v1, %v1255_v57  ;;  %1844 = vperm.xlu2 %2468, %v1734_v23   ;;  %1841 = vperm.xlu0 %2467, %v1733_v50   ;;  %v1743_v57 = vadd.f32 %v3395_v5, %v1604_v61 }
 0x3bd   : > { %v2298_v33 = vclamps-f32 %v1292_v49, 5e+08 }
 0x3be   : > { %v1381_v17 = vpop.xlane.xlu0 %1380 }
 0x3bf   : > { %v1597_v28 = vmul.f32 %v2298_v33, %v3328_v44  ;;  %v1778_v33 = vmul.f32 %v2308_v42, %v3244_v9 }
 0x3c1   : > { %v1736_v40 = vadd.f32 %v3369_v47, %v1597_v28  ;;  %v1424_v28 = vadd.f32 %v3242_v7, %v1381_v17  ;;  %v1794_v53 = vadd.f32 %v1778_v33, %v3345_v51 }
 0x3c2   : > { %v1264_v60 = vpop.xlane.xlu2 %1263 }
 0x3c3   : > { %v1295_v43 = vadd.f32 %v3240_v1, %v1264_v60  ;;  %1853 = vperm.xlu2 %2468, %v1737_v24   ;;  %1850 = vperm.xlu0 %2467, %v1736_v40   ;;  %v1777_v24 = vmul.f32 %v2307_v31, %v3319_v26  ;;  %v2311_v34 = vclamps-f32 %v1424_v28, 5e+08 }
 0x3c5   : > { %v2301_v56 = vclamps-f32 %v1295_v43, 5e+08  ;;  %v1793_v9 = vadd.f32 %v1777_v24, %v3386_v32  ;;  %v1781_v26 = vmul.f32 %v2311_v34, %v3323_v3 }
 0x3c6   : > { %v1390_v40 = vpop.xlane.xlu0 %1389 }
 0x3c7   : > { %v1600_v55 = vmul.f32 %v2301_v56, %v3254_v41  ;;  %v1797_v32 = vadd.f32 %v1781_v26, %v3361_v20 }
 0x3c9   : > { %v1739_v25 = vadd.f32 %v3393_v48, %v1600_v55 }
 0x3ca   : > { %v1273_v46 = vpop.xlane.xlu2 %1272 }
 0x3cb   : > { %v1298_v30 = vadd.f32 %v3240_v1, %v1273_v46  ;;  %1862 = vperm.xlu2 %2468, %v1740_v37   ;;  %1859 = vperm.xlu0 %2467, %v1739_v25   ;;  %v1427_v37 = vadd.f32 %v3242_v7, %v1390_v40 }
 0x3cd   : > { %v2304_v29 = vclamps-f32 %v1298_v30, 5e+08  ;;  %v2314_v30 = vclamps-f32 %v1427_v37, 5e+08 }
 0x3ce   : > { %v1378_v23 = vpop.xlane.xlu1 %1377  ;;  %v1399_v46 = vpop.xlane.xlu0 %1398 }
 0x3cf   : > { %v1603_v50 = vmul.f32 %v2304_v29, %v3272_v21  ;;  %v1423_v45 = vadd.f32 %v3242_v7, %v1378_v23 }
 0x3d1   : > { %v1742_v49 = vadd.f32 %v3371_v16, %v1603_v50  ;;  %v2310_v8 = vclamps-f32 %v1423_v45, 5e+08 }
 0x3d2   : > { %v1366_v1 = vpop.xlane.xlu2 %1365 }
 0x3d3   : > { %v1419_v18 = vadd.f32 %v3242_v7, %v1366_v1  ;;  %1871 = vperm.xlu2 %2468, %v1743_v57   ;;  %1868 = vperm.xlu0 %2467, %v1742_v49   ;;  %v1780_v25 = vmul.f32 %v2310_v8, %v3246_v10  ;;  %v1784_v10 = vmul.f32 %v2314_v30, %v3328_v44 }
 0x3d5   : > { %v2306_v14 = vclamps-f32 %v1419_v18, 5e+08  ;;  %v1796_v3 = vadd.f32 %v1780_v25, %v3347_v59  ;;  %v1800_v57 = vadd.f32 %v1784_v10, %v3369_v47 }
 0x3d6   : > { %v1387_v43 = vpop.xlane.xlu1 %1386  ;;  %v1408_v49 = vpop.xlane.xlu0 %1407 }
 0x3d7   : > { %v1776_v60 = vmul.f32 %v2306_v14, %v3353_v4  ;;  %v1426_v51 = vadd.f32 %v3242_v7, %v1387_v43 }
 0x3d9   : > { %v1792_v56 = vadd.f32 %v1776_v60, %v3349_v58  ;;  %v2313_v13 = vclamps-f32 %v1426_v51, 5e+08 }
 0x3da   : > { %v1375_v55 = vpop.xlane.xlu2 %1374 }
 0x3db   : > { %v1422_v2 = vadd.f32 %v3242_v7, %v1375_v55  ;;  %1933 = vperm.xlu2 %2468, %v1794_v53   ;;  %1927 = vperm.xlu1 %2469, %v1792_v56   ;;  %v1783_v50 = vmul.f32 %v2313_v13, %v3373_v22  ;;  %v3732_v55 = vlaneseq }
 0x3dc   : > { %1930 = vperm.xlu0 %2467, %v1793_v9  }
 0x3dd   : > { %v2309_v4 = vclamps-f32 %v1422_v2, 5e+08  ;;  %v1799_v18 = vadd.f32 %v1783_v50, %v3351_v0  ;;  %v1874_v9 = vand.u32 127, %v3732_v55 }
 0x3de   : > { %v1396_v17 = vpop.xlane.xlu1 %1395 }
 0x3df   : > { %v1779_v58 = vmul.f32 %v2309_v4, %v3321_v27  ;;  %v1430_v27 = vadd.f32 %v3242_v7, %v1399_v46  ;;  %v1429_v20 = vadd.f32 %v3242_v7, %v1396_v17  ;;  %v3574_v26 = vadd.s32 4294967256, %v1874_v9 }
 0x3e1   : > { %v1795_v61 = vadd.f32 %v1779_v58, %v3355_v6  ;;  %v2317_v42 = vclamps-f32 %v1430_v27, 5e+08  ;;  %v2316_v31 = vclamps-f32 %v1429_v20, 5e+08 }
 0x3e2   : > { %v1384_v29 = vpop.xlane.xlu2 %1383 }
 0x3e3   : > { %v1425_v12 = vadd.f32 %v3242_v7, %v1384_v29  ;;  %1942 = vperm.xlu2 %2468, %v1797_v32   ;;  %1936 = vperm.xlu1 %2469, %v1795_v61   ;;  %v1787_v22 = vmul.f32 %v2317_v42, %v3254_v41  ;;  %v1786_v47 = vmul.f32 %v2316_v31, %v3335_v52 }
 0x3e4   : > { %1939 = vperm.xlu0 %2467, %v1796_v3  }
 0x3e5   : > { %v2312_v23 = vclamps-f32 %v1425_v12, 5e+08  ;;  %v1803_v0 = vadd.f32 %v1787_v22, %v3393_v48  ;;  %v1802_v43 = vadd.f32 %v1786_v47, %v3375_v54  ;;  %v2474_v54 = vld [vmem:[%s3682_s9] ss:$0 sm:$0xff] }
 0x3e6   : > { %v1405_v44 = vpop.xlane.xlu1 %1404 }
 0x3e7   : > { %v1782_v6 = vmul.f32 %v2312_v23, %v3248_v15  ;;  %v1433_v15 = vadd.f32 %v3242_v7, %v1408_v49 }
 0x3e9   : > { %v1798_v59 = vadd.f32 %v1782_v6, %v3365_v38  ;;  %v1432_v38 = vadd.f32 %v3242_v7, %v1405_v44  ;;  %v2320_v24 = vclamps-f32 %v1433_v15, 5e+08  ;;  %v1827_v37 = vpop.permute.xlu0 %1826 }
 0x3ea   : > { %v1393_v1 = vpop.xlane.xlu2 %1392 }
 0x3eb   : > { %v1428_v33 = vadd.f32 %v3242_v7, %v1393_v1  ;;  %1951 = vperm.xlu2 %2468, %v1800_v57   ;;  %1945 = vperm.xlu1 %2469, %v1798_v59   ;;  %v2319_v45 = vclamps-f32 %v1432_v38, 5e+08  ;;  %v1790_v52 = vmul.f32 %v2320_v24, %v3272_v21 }
 0x3ec   : > { %1948 = vperm.xlu0 %2467, %v1799_v18  }
 0x3ed   : > { %v2315_v28 = vclamps-f32 %v1428_v33, 5e+08  ;;  %v1789_v53 = vmul.f32 %v2319_v45, %v3340_v62  ;;  %v1806_v48 = vadd.f32 %v1790_v52, %v3371_v16  ;;  %v3571_v16 = vadd.s32 4294967264, %v1874_v9 }
 0x3ef   : > { %v1785_v14 = vmul.f32 %v2315_v28, %v3250_v35  ;;  %v1805_v8 = vadd.f32 %v1789_v53, %v3391_v36 }
 0x3f1   : > { %v1801_v40 = vadd.f32 %v1785_v14, %v3357_v11  ;;  %v3590_v14 = vadd.s32 4294967248, %v1874_v9 }
 0x3f2   : > { %v1402_v60 = vpop.xlane.xlu2 %1401 }
 0x3f3   : > { %v1431_v41 = vadd.f32 %v3242_v7, %v1402_v60  ;;  %1960 = vperm.xlu2 %2468, %v1803_v0   ;;  %1954 = vperm.xlu1 %2469, %v1801_v40   ;;  %v1976_v0 = vadd.s32 4294967240, %v1874_v9 }
 0x3f4   : > { %1957 = vperm.xlu0 %2467, %v1802_v43  }
 0x3f5   : > { %v2318_v34 = vclamps-f32 %v1431_v41, 5e+08 }
 0x3f7   : > { %v1788_v35 = vmul.f32 %v2318_v34, %v3359_v19  ;;  %v3733_v19 = vld [vmem:[#allocation30_spill] sm:$0xff] }
 0x3f8   : > { %v1035_v2 = vadd.f32 %v2474_v54, %v3733_v19 }
 0x3f9   : > { %v1804_v11 = vadd.f32 %v1788_v35, %v3363_v39 }
 0x3fa   : > { %v1411_v56 = vpop.xlane.xlu2 %1410  ;;  %v2273_v36 = vclamps-f32 %v1035_v2, 5e+08 }
 0x3fb   : > { %v1434_v21 = vadd.f32 %v3242_v7, %v1411_v56  ;;  %1969 = vperm.xlu2 %2468, %v1806_v48   ;;  %1963 = vperm.xlu1 %2469, %v1804_v11   ;;  %v1876_v7 = vperm.slane %v1827_v37, %v3571_v16 }
 0x3fc   : > { %1966 = vperm.xlu0 %2467, %v1805_v8  }
 0x3fd   : > { %v2321_v62 = vclamps-f32 %v1434_v21, 5e+08 }
 0x3ff   : > { %v1791_v39 = vmul.f32 %v2321_v62, %v3343_v63 }
 0x401   : > { %v1807_v4 = vadd.f32 %v1791_v39, %v3395_v5 }
 0x402   : > { %v1830_v25 = vpop.permute.xlu2 %1829 }
 0x403   : > { %v1878_v51 = vperm.slane %v1830_v25, %v3574_v26  ;;  %1972 = vperm.xlu1 %2469, %v1807_v4  }
 0x404   : > { %2010 = vrot.lane.b32.xlu0 %v2273_v36, %s2779_s17 }
 0x405   : > { %v1880_v58 = vsel %vm1879_vm9, %v1878_v51, %v1876_v7 }
 0x407   : > { %v1833_v46 = vpop.permute.xlu1 %1832 }
 0x408   : > { %v1881_v63 = vperm.slane %v1833_v46, %v3571_v16 }
 0x40d   : > { %v1836_v30 = vpop.permute.xlu2 %1835 }
 0x40e   : > { %v1882_v17 = vperm.slane %v1836_v30, %v3574_v26 }
 0x40f   : > { %v1839_v13 = vpop.permute.xlu1 %1838 }
 0x410   : > { %v1883_v5 = vsel %vm1879_vm9, %v1882_v17, %v1881_v63  ;;  %v1884_v12 = vperm.slane %v1839_v13, %v3571_v16 }
 0x411   : > { %v1902_v32 = vsel %vm928_vm1, %v1883_v5, %v1880_v58 }
 0x415   : > { %v1845_v61 = vpop.permute.xlu2 %1844 }
 0x416   : > { %v1887_v48 = vperm.slane %v1845_v61, %v3571_v16 }
 0x417   : > { %v1848_v23 = vpop.permute.xlu1 %1847 }
 0x418   : > { %v1888_v60 = vperm.slane %v1848_v23, %v3574_v26 }
 0x41a   : > { %v1889_v21 = vsel %vm1879_vm9, %v1888_v60, %v1887_v48 }
 0x41d   : > { %v1854_v29 = vpop.permute.xlu2 %1853 }
 0x41e   : > { %v1891_v11 = vperm.slane %v1854_v29, %v3574_v26 }
 0x41f   : > { %v1857_v42 = vpop.permute.xlu1 %1856 }
 0x420   : > { %v1893_v56 = vperm.slane %v1857_v42, %v3571_v16 }
 0x425   : > { %v3588_v6 = vpop.permute.xlu2 %1862 }
 0x427   : > { %v1866_v49 = vpop.permute.xlu1 %1865 }
 0x428   : > { %v1897_v39 = vperm.slane %v1866_v49, %v3574_v26 }
 0x42d   : > { %v1842_v3 = vpop.permute.xlu0 %1841  ;;  %v1872_v59 = vpop.permute.xlu2 %1871 }
 0x42e   : > { %v1885_v10 = vperm.slane %v1842_v3, %v3574_v26  ;;  %v1900_v30 = vperm.slane %v1872_v59, %v3574_v26  ;;  %v1896_v3 = vperm.slane %v3588_v6, %v3571_v16 }
 0x430   : > { %v1886_v27 = vsel %vm1879_vm9, %v1885_v10, %v1884_v12 }
 0x431   : > { %v1903_v50 = vsel %vm930_vm2, %v1886_v27, %v1902_v32 }
 0x432   : > { %v1904_v63 = vsel %vm932_vm3, %v1889_v21, %v1903_v50 }
 0x435   : > { %v1851_v20 = vpop.permute.xlu0 %1850  ;;  %v1934_v1 = vpop.permute.xlu2 %1933 }
 0x436   : > { %v1980_v43 = vperm.slane %v1934_v1, %v3590_v14  ;;  %v1890_v52 = vperm.slane %v1851_v20, %v3571_v16  ;;  %v1898_v20 = vsel %vm1879_vm9, %v1897_v39, %v1896_v3 }
 0x438   : > { %v1892_v37 = vsel %vm1879_vm9, %v1891_v11, %v1890_v52 }
 0x439   : > { %v1905_v32 = vsel %vm934_vm4, %v1892_v37, %v1904_v63 }
 0x43d   : > { %v1860_v57 = vpop.permute.xlu0 %1859  ;;  %v1943_v33 = vpop.permute.xlu2 %1942 }
 0x43e   : > { %v1894_v34 = vperm.slane %v1860_v57, %v3574_v26  ;;  %v1984_v62 = vperm.slane %v1943_v33, %v1976_v0 }
 0x440   : > { %v1895_v4 = vsel %vm1879_vm9, %v1894_v34, %v1893_v56 }
 0x441   : > { %v1906_v12 = vsel %vm936_vm5, %v1895_v4, %v1905_v32 }
 0x445   : > { %v1869_v31 = vpop.permute.xlu0 %1868  ;;  %v1952_v38 = vpop.permute.xlu2 %1951 }
 0x446   : > { %v1989_v7 = vperm.slane %v1952_v38, %v3590_v14  ;;  %v1899_v51 = vperm.slane %v1869_v31, %v3571_v16  ;;  %v1907_v16 = vsel %vm938_vm6, %v1898_v20, %v1906_v12 }
 0x448   : > { %v1901_v27 = vsel %vm1879_vm9, %v1900_v30, %v1899_v51 }
 0x449   : > { %v1908_v49 = vsel %vm940_vm7, %v1901_v27, %v1907_v16 }
 0x44d   : > { %v1928_v18 = vpop.permute.xlu1 %1927  ;;  %v1961_v41 = vpop.permute.xlu2 %1960 }
 0x44e   : > { %v1931_v44 = vpop.permute.xlu0 %1930  ;;  %v1975_v35 = vperm.slane %v1928_v18, %v3590_v14  ;;  %v1993_v10 = vperm.slane %v1961_v41, %v1976_v0 }
 0x44f   : > { %v1977_v53 = vperm.slane %v1931_v44, %v1976_v0 }
 0x451   : > { %v1979_v36 = vsel %vm1978_vm10, %v1977_v53, %v1975_v35 }
 0x455   : > { %v1937_v22 = vpop.permute.xlu1 %1936  ;;  %v1970_v23 = vpop.permute.xlu2 %1969 }
 0x456   : > { %v1940_v15 = vpop.permute.xlu0 %1939  ;;  %v1981_v45 = vperm.slane %v1937_v22, %v1976_v0  ;;  %v1998_v31 = vperm.slane %v1970_v23, %v3590_v14  ;;  %v3735_v22 = vld [vmem:[#allocation29_spill] sm:$0xff] }
 0x457   : > { %v1983_v54 = vperm.slane %v1940_v15, %v3590_v14  ;;  %v2013_v15 = vsel %vm812_vm0, %v3735_v22, %v1908_v49 }
 0x458   : > { %v1982_v8 = vsel %vm1978_vm10, %v1981_v45, %v1980_v43 }
 0x459   : > { %v1985_v58 = vsel %vm1978_vm10, %v1984_v62, %v1983_v54  ;;  %v2001_v46 = vsel %vm928_vm1, %v1982_v8, %v1979_v36 }
 0x45a   : > { %v2002_v26 = vsel %vm930_vm2, %v1985_v58, %v2001_v46 }
 0x45d   : > { %v1946_v28 = vpop.permute.xlu1 %1945 }
 0x45e   : > { %v1949_v47 = vpop.permute.xlu0 %1948  ;;  %v1986_v9 = vperm.slane %v1946_v28, %v3590_v14 }
 0x45f   : > { %v1987_v55 = vperm.slane %v1949_v47, %v1976_v0 }
 0x461   : > { %v1988_v17 = vsel %vm1978_vm10, %v1987_v55, %v1986_v9 }
 0x462   : > { %v2003_v50 = vsel %vm932_vm3, %v1988_v17, %v2002_v26 }
 0x465   : > { %v1955_v24 = vpop.permute.xlu1 %1954 }
 0x466   : > { %v1958_v40 = vpop.permute.xlu0 %1957  ;;  %v1990_v19 = vperm.slane %v1955_v24, %v1976_v0 }
 0x467   : > { %v1992_v5 = vperm.slane %v1958_v40, %v3590_v14 }
 0x468   : > { %v1991_v61 = vsel %vm1978_vm10, %v1990_v19, %v1989_v7 }
 0x469   : > { %v1994_v42 = vsel %vm1978_vm10, %v1993_v10, %v1992_v5  ;;  %v2004_v57 = vsel %vm934_vm4, %v1991_v61, %v2003_v50 }
 0x46a   : > { %v2005_v18 = vsel %vm936_vm5, %v1994_v42, %v2004_v57 }
 0x46d   : > { %v1964_v2 = vpop.permute.xlu1 %1963 }
 0x46e   : > { %v1967_v25 = vpop.permute.xlu0 %1966  ;;  %v1995_v29 = vperm.slane %v1964_v2, %v3590_v14 }
 0x46f   : > { %v1996_v13 = vperm.slane %v1967_v25, %v1976_v0 }
 0x471   : > { %v1997_v6 = vsel %vm1978_vm10, %v1996_v13, %v1995_v29 }
 0x472   : > { %v2006_v44 = vsel %vm938_vm6, %v1997_v6, %v2005_v18 }
 0x475   : > { %v1973_v59 = vpop.permute.xlu1 %1972 }
 0x476   : > { %v1999_v1 = vperm.slane %v1973_v59, %v1976_v0  ;;  %v2011_v47 = vpop.permute.xlu0 %2010 }
 0x478   : > { %v2000_v33 = vsel %vm1978_vm10, %v1999_v1, %v1998_v31 }
 0x479   : > { %v2007_v28 = vsel %vm940_vm7, %v2000_v33, %v2006_v44 }
 0x47a   : > { %v2015_v38 = vsel %vm2014_vm11, %v2013_v15, %v2007_v28 }
 0x47b   : > { %v2016_v14 = vsel %vm983_vm8, %v2015_v38, %v2011_v47 }
 0x47c   : > { %v2018_v24 = vsel %vm2017_vm12, %v2016_v14, 0.0 }
 0x47d   : > { %2019 = vst [vmem:[%s668_s12] sm:$0xff] %v2018_v24 }
 0x47e   : > { %2712 = shalt.err (!%p2709_p13)
}
 0x47f   : > { %2362 = dma.vmem_to_hbm [thread:$0]  (%p2941_p3), %s2034_s6, 128, %s2036_s25, %s2021_s5  }
 0x480 PF: > { %s3737_s23 = sld [smem:[#allocation23_spill]]  ;;  %p3739_p8 = scmp.ge.s32.totalorder %s2767_s19, 2 }
 0x482   : > { %p2388_p9 = pnand %p3739_p8, %p2896_p6 }
 0x484   : > { %p2389_p12 = pneg %p2388_p9 }
 0x486   : > { %s2047_s30 = sand.u32 1, %s3737_s23  }
 0x487   : > { %s2048_s17 = scalar_lea.sflag [#allocation6], %s2047_s30 }
 0x488   : > { %2750 = dma.done.wait (%p2389_p12), %s2048_s17, 128  }
 0x489   : > { %2752 = vsyncadd (%p2389_p12), %s2048_s17, 4294967168  ;;  %s3740_s19 = sld [smem:[#allocation26_spill]]  ;;  %s3743_s17 = smov %s2759_s18 }
 0x48a   : > { %s3741_s21 = sld [smem:[#allocation24_spill]] }
 0x48b   : > { %s3742_s12 = sld [smem:[#allocation28_spill]] }
 0x48f   : > { %p38_p0 = scmp.ge.s32.totalorder %s3740_s19, 4  }
 0x490   : > { %s3744_s18 = smov %s3741_s21 }
 0x491   :  { %40 = sbr.rel (!%p38_p0) target bundleno = 16 (0x10), region = 173 }
 0x496   :  { %2054 = vsyncpa [#allocation5], 1 }
 0x497   :  { %2056 = vsyncpa [#allocation5 + $0x1], 1 }
 0x498   :  { %2057 = vsyncpa [#allocation8], 1 }
 0x499   :  { %2059 = vsyncpa [#allocation8 + $0x1], 1 }
 0x49a   :  { %2060 = vsyncpa [#allocation11], 1 }
 0x49b   :  { %2062 = vsyncpa [#allocation11 + $0x1], 1 }
 0x49c   :  { %2063 = vsyncpa [#allocation14], 1 }
 0x49d   :  { %2064 = vsyncpa [#allocation6], 1 }
 0x49e   :  { %2066 = vsyncpa [#allocation6 + $0x1], 1 }

</bundles_post_ra>
